<compile_context>
chip_gen: v5e
topology: v5e:2x2
jax: 0.10.0
libtpu: 0.0.40
codegen_flags: <defaults>
</compile_context>

<pallas_src>
import jax
import jax.numpy as jnp
from jax.experimental import pallas as pl
from jax.experimental.pallas import tpu as pltpu


def _round_up(x, m):
    return ((x + m - 1) // m) * m


def _prelu(x, a):
    return jnp.maximum(x, 0.0) + a * jnp.minimum(x, 0.0)


def mlp_kernel(scalars_ref,                # SMEM: [a_hid, a_out, b3]
               x_ref, w1_ref, b1_ref,      # VMEM: streamed x tile, resident weights
               w2_ref, b2_ref, w3_ref,
               o_ref):                     # VMEM: lane-dense (TB//128, 128) output
    # Hoist scalar reads above all vector work.
    a_hid = scalars_ref[0]
    a_out = scalars_ref[1]
    b3 = scalars_ref[2]

    # Linear(156 -> 128) + PReLU  (bf16 MXU matmul, f32 accumulation)
    x = x_ref[...].astype(jnp.bfloat16)
    h = jnp.dot(x, w1_ref[...], preferred_element_type=jnp.float32) + b1_ref[...]
    h = _prelu(h, a_hid)

    # DropoutMC(activate=False), eval mode -> identity (no-op)

    # Linear(128 -> 128) + PReLU  (bf16 MXU matmul, f32 accumulation)
    h = jnp.dot(h.astype(jnp.bfloat16), w2_ref[...],
                preferred_element_type=jnp.float32) + b2_ref[...]
    h = _prelu(h, a_hid)

    # TODO(synk): DropoutDPP(activate=True) applies a DPP-sampled mask even in eval
    # mode, but build_mask('dpp') is not defined in the provided source; treated as
    # identity here.

    # Linear(128 -> 1) + final PReLU.
    # N=1 matmul would waste 127/255 MXU columns and pay full MXU push/pop latency;
    # use a VPU multiply + lane reduction and emit the result lane-dense.
    tb = h.shape[0]
    prod = h * w3_ref[...]                                   # (tb, h2) * (1, h2)
    out = jnp.sum(prod.reshape(tb // 128, 128, prod.shape[-1]), axis=-1) + b3
    out = _prelu(out, a_out)
    o_ref[...] = out.astype(o_ref.dtype)                     # (tb//128, 128)


def aimeetsai_mcd_dpp_forward(features, params, *, tile_b=1024):
    """features: (B, input_dims) f32.  params: dict of weights/biases/prelu slopes."""
    B, in_dim = features.shape
    h1 = params["w1"].shape[1]
    h2 = params["w2"].shape[1]

    # Batch tile: multiple of 256 (MXU M dim on v6e/v7x, multiple of 128 for the
    # lane-dense output slab).  Large tiles pipeline well; small B just rounds up.
    tb = min(tile_b, _round_up(B, 256))
    b_pad = _round_up(B, tb)

    x = features.astype(jnp.float32)
    if b_pad != B:
        x = jnp.pad(x, ((0, b_pad - B), (0, 0)))

    # SMEM scalars: PReLU slopes + final-layer bias.
    scalars = jnp.stack([params["a_hid"].reshape(()),
                         params["a_out"].reshape(()),
                         params["b3"].reshape(())]).astype(jnp.float32)

    w1 = params["w1"].astype(jnp.bfloat16)                  # (in_dim, h1)
    w2 = params["w2"].astype(jnp.bfloat16)                  # (h1, h2)
    w3 = params["w3"].reshape(1, h2).astype(jnp.float32)    # (1, h2) row for VPU path
    b1 = params["b1"].astype(jnp.float32)                   # (1, h1)
    b2 = params["b2"].astype(jnp.float32)                   # (1, h2)

    const = lambda i: (0, 0)   # weights stay VMEM-resident across batch tiles

    out2d = pl.pallas_call(
        mlp_kernel,
        out_shape=jax.ShapeDtypeStruct((b_pad // 128, 128), jnp.float32),
        grid_spec=pltpu.PrefetchScalarGridSpec(
            num_scalar_prefetch=0,
            grid=(b_pad // tb,),
            in_specs=[
                pl.BlockSpec(memory_space=pltpu.MemorySpace.SMEM),   # scalars
                pl.BlockSpec((tb, in_dim), lambda i: (i, 0)),        # x tile (streamed)
                pl.BlockSpec((in_dim, h1), const),                   # W1
                pl.BlockSpec((1, h1), const),                        # b1
                pl.BlockSpec((h1, h2), const),                       # W2
                pl.BlockSpec((1, h2), const),                        # b2
                pl.BlockSpec((1, h2), const),                        # W3 row
            ],
            out_specs=pl.BlockSpec((tb // 128, 128), lambda i: (i, 0)),
        ),
        compiler_params=pltpu.CompilerParams(
            dimension_semantics=("parallel",)),
    )(scalars, x, w1, b1, w2, b2, w3)

    out = out2d.reshape(b_pad, 1)[:B]
    return {"output": out}


def init_params(key, input_dims=156, hidden_dims=(128, 128)):
    """Deterministic init mimicking torch.nn.Linear (U[-1/sqrt(fan_in), 1/sqrt(fan_in)])."""
    dims = [input_dims] + list(hidden_dims) + [1]
    names = ["1", "2", "3"]
    params = {}
    for name, (din, dout) in zip(names, zip(dims[:-1], dims[1:])):
        key, kw, kb = jax.random.split(key, 3)
        bound = 1.0 / (din ** 0.5)
        params[f"w{name}"] = jax.random.uniform(
            kw, (din, dout), jnp.float32, minval=-bound, maxval=bound)
        params[f"b{name}"] = jax.random.uniform(
            kb, (1, dout), jnp.float32, minval=-bound, maxval=bound)
    # nn.PReLU() default single slope 0.25 (shared hidden-activation instance,
    # separate final-activation instance).
    params["a_hid"] = jnp.array([0.25], dtype=jnp.float32)
    params["a_out"] = jnp.array([0.25], dtype=jnp.float32)
    return params


if __name__ == "__main__":
    key = jax.random.PRNGKey(0)
    k_params, k_x = jax.random.split(key)

    B, INPUT_DIMS = 8, 156
    params = init_params(k_params, input_dims=INPUT_DIMS, hidden_dims=(128, 128))
    features = jax.random.normal(k_x, (B, INPUT_DIMS), dtype=jnp.float32)

    result = aimeetsai_mcd_dpp_forward(features, params)
    jax.block_until_ready(result["output"])

    assert result["output"].shape == (B, 1)
    print("KERNEL_OK")
</pallas_src>

<mosaic_0001>
module attributes {stable_mosaic.version = 11 : i64} {
  func.func @mlp_kernel(%arg0: i32, %arg1: memref<3xf32, #tpu.memory_space<smem>>, %arg2: memref<256x156xf32, #tpu.memory_space<vmem>>, %arg3: memref<156x128xbf16, #tpu.memory_space<vmem>>, %arg4: memref<1x128xf32, #tpu.memory_space<vmem>>, %arg5: memref<128x128xbf16, #tpu.memory_space<vmem>>, %arg6: memref<1x128xf32, #tpu.memory_space<vmem>>, %arg7: memref<1x128xf32, #tpu.memory_space<vmem>>, %arg8: memref<2x128xf32, #tpu.memory_space<vmem>>) attributes {dimension_semantics = [#tpu.dimension_semantics<parallel>], iteration_bounds = array<i64: 1>, scalar_prefetch = 0 : i64, scratch_operands = 0 : i64, tpu.core_type = #tpu.core_type<tc>, window_params = [{transform_indices = @transform_0, window_bounds = array<i64: 3>}, {transform_indices = @transform_1, window_bounds = array<i64: 256, 156>}, {pipeline_mode = #tpu.pipeline_mode<synchronous>, transform_indices = @transform_2, window_bounds = array<i64: 156, 128>}, {pipeline_mode = #tpu.pipeline_mode<synchronous>, transform_indices = @transform_3, window_bounds = array<i64: 1, 128>}, {pipeline_mode = #tpu.pipeline_mode<synchronous>, transform_indices = @transform_4, window_bounds = array<i64: 128, 128>}, {pipeline_mode = #tpu.pipeline_mode<synchronous>, transform_indices = @transform_5, window_bounds = array<i64: 1, 128>}, {pipeline_mode = #tpu.pipeline_mode<synchronous>, transform_indices = @transform_6, window_bounds = array<i64: 1, 128>}, {transform_indices = @transform_7, window_bounds = array<i64: 2, 128>}]} {
    %c0 = arith.constant 0 : index
    %0 = memref.load %arg1[%c0] : memref<3xf32, #tpu.memory_space<smem>>
    %c1 = arith.constant 1 : index
    %1 = memref.load %arg1[%c1] : memref<3xf32, #tpu.memory_space<smem>>
    %c2 = arith.constant 2 : index
    %2 = memref.load %arg1[%c2] : memref<3xf32, #tpu.memory_space<smem>>
    %c0_0 = arith.constant 0 : index
    %c0_1 = arith.constant 0 : index
    %3 = vector.load %arg2[%c0_0, %c0_1] : memref<256x156xf32, #tpu.memory_space<vmem>>, vector<256x156xf32>
    %4 = arith.truncf %3 : vector<256x156xf32> to vector<256x156xbf16>
    %c0_2 = arith.constant 0 : index
    %c0_3 = arith.constant 0 : index
    %5 = vector.load %arg3[%c0_2, %c0_3] : memref<156x128xbf16, #tpu.memory_space<vmem>>, vector<156x128xbf16>
    %cst = arith.constant dense<0.000000e+00> : vector<256x128xf32>
    %6 = tpu.matmul %4, %5, %cst {dimension_numbers = #tpu.dot_dimension_numbers<[1], [0], [0], [1], [0, 0, 1, 1], [], []>} : vector<256x156xbf16>, vector<156x128xbf16>, vector<256x128xf32> -> vector<256x128xf32>
    %c0_4 = arith.constant 0 : index
    %c0_5 = arith.constant 0 : index
    %7 = vector.load %arg4[%c0_4, %c0_5] : memref<1x128xf32, #tpu.memory_space<vmem>>, vector<1x128xf32>
    %8 = vector.broadcast %7 : vector<1x128xf32> to vector<256x128xf32>
    %9 = arith.addf %6, %8 : vector<256x128xf32>
    %cst_6 = arith.constant 0.000000e+00 : f32
    %10 = vector.broadcast %cst_6 : f32 to vector<256x128xf32>
    %11 = arith.maximumf %9, %10 : vector<256x128xf32>
    %cst_7 = arith.constant 0.000000e+00 : f32
    %12 = vector.broadcast %cst_7 : f32 to vector<256x128xf32>
    %13 = arith.minimumf %9, %12 : vector<256x128xf32>
    %14 = vector.broadcast %0 : f32 to vector<256x128xf32>
    %15 = arith.mulf %14, %13 : vector<256x128xf32>
    %16 = arith.addf %11, %15 : vector<256x128xf32>
    %17 = arith.truncf %16 : vector<256x128xf32> to vector<256x128xbf16>
    %c0_8 = arith.constant 0 : index
    %c0_9 = arith.constant 0 : index
    %18 = vector.load %arg5[%c0_8, %c0_9] : memref<128x128xbf16, #tpu.memory_space<vmem>>, vector<128x128xbf16>
    %cst_10 = arith.constant dense<0.000000e+00> : vector<256x128xf32>
    %19 = tpu.matmul %17, %18, %cst_10 {dimension_numbers = #tpu.dot_dimension_numbers<[1], [0], [0], [1], [0, 0, 1, 1], [], []>} : vector<256x128xbf16>, vector<128x128xbf16>, vector<256x128xf32> -> vector<256x128xf32>
    %c0_11 = arith.constant 0 : index
    %c0_12 = arith.constant 0 : index
    %20 = vector.load %arg6[%c0_11, %c0_12] : memref<1x128xf32, #tpu.memory_space<vmem>>, vector<1x128xf32>
    %21 = vector.broadcast %20 : vector<1x128xf32> to vector<256x128xf32>
    %22 = arith.addf %19, %21 : vector<256x128xf32>
    %cst_13 = arith.constant 0.000000e+00 : f32
    %23 = vector.broadcast %cst_13 : f32 to vector<256x128xf32>
    %24 = arith.maximumf %22, %23 : vector<256x128xf32>
    %cst_14 = arith.constant 0.000000e+00 : f32
    %25 = vector.broadcast %cst_14 : f32 to vector<256x128xf32>
    %26 = arith.minimumf %22, %25 : vector<256x128xf32>
    %27 = vector.broadcast %0 : f32 to vector<256x128xf32>
    %28 = arith.mulf %27, %26 : vector<256x128xf32>
    %29 = arith.addf %24, %28 : vector<256x128xf32>
    %c0_15 = arith.constant 0 : index
    %c0_16 = arith.constant 0 : index
    %30 = vector.load %arg7[%c0_15, %c0_16] : memref<1x128xf32, #tpu.memory_space<vmem>>, vector<1x128xf32>
    %31 = vector.broadcast %30 : vector<1x128xf32> to vector<256x128xf32>
    %32 = arith.mulf %29, %31 : vector<256x128xf32>
    %33 = vector.shape_cast %32 : vector<256x128xf32> to vector<2x128x128xf32>
    %cst_17 = arith.constant dense<0.000000e+00> : vector<2x128xf32>
    %34 = vector.multi_reduction <add>, %33, %cst_17 [2] : vector<2x128x128xf32> to vector<2x128xf32>
    %35 = vector.broadcast %2 : f32 to vector<2x128xf32>
    %36 = arith.addf %34, %35 : vector<2x128xf32>
    %cst_18 = arith.constant 0.000000e+00 : f32
    %37 = vector.broadcast %cst_18 : f32 to vector<2x128xf32>
    %38 = arith.maximumf %36, %37 : vector<2x128xf32>
    %cst_19 = arith.constant 0.000000e+00 : f32
    %39 = vector.broadcast %cst_19 : f32 to vector<2x128xf32>
    %40 = arith.minimumf %36, %39 : vector<2x128xf32>
    %41 = vector.broadcast %1 : f32 to vector<2x128xf32>
    %42 = arith.mulf %41, %40 : vector<2x128xf32>
    %43 = arith.addf %38, %42 : vector<2x128xf32>
    %c0_20 = arith.constant 0 : index
    %c0_21 = arith.constant 0 : index
    %44 = vector.load %arg8[%c0_20, %c0_21] : memref<2x128xf32, #tpu.memory_space<vmem>>, vector<2x128xf32>
    tpu.vector_store %arg8[%c0_20, %c0_21], %43 {strides = array<i32>} : memref<2x128xf32, #tpu.memory_space<vmem>>, vector<2x128xf32>,
    return
  }
  func.func @transform_0(%arg0: i32) -> i32 {
    %c0_i32 = arith.constant 0 : i32
    %c0_i32_0 = arith.constant 0 : i32
    return %c0_i32 : i32
  }
  func.func @transform_1(%arg0: i32) -> (i32, i32) {
    %c0_i32 = arith.constant 0 : i32
    %c0_i32_0 = arith.constant 0 : i32
    return %arg0, %c0_i32 : i32, i32
  }
  func.func @transform_2(%arg0: i32) -> (i32, i32) {
    %c0_i32 = arith.constant 0 : i32
    %c0_i32_0 = arith.constant 0 : i32
    %c0_i32_1 = arith.constant 0 : i32
    return %c0_i32, %c0_i32_0 : i32, i32
  }
  func.func @transform_3(%arg0: i32) -> (i32, i32) {
    %c0_i32 = arith.constant 0 : i32
    %c0_i32_0 = arith.constant 0 : i32
    %c0_i32_1 = arith.constant 0 : i32
    return %c0_i32, %c0_i32_0 : i32, i32
  }
  func.func @transform_4(%arg0: i32) -> (i32, i32) {
    %c0_i32 = arith.constant 0 : i32
    %c0_i32_0 = arith.constant 0 : i32
    %c0_i32_1 = arith.constant 0 : i32
    return %c0_i32, %c0_i32_0 : i32, i32
  }
  func.func @transform_5(%arg0: i32) -> (i32, i32) {
    %c0_i32 = arith.constant 0 : i32
    %c0_i32_0 = arith.constant 0 : i32
    %c0_i32_1 = arith.constant 0 : i32
    return %c0_i32, %c0_i32_0 : i32, i32
  }
  func.func @transform_6(%arg0: i32) -> (i32, i32) {
    %c0_i32 = arith.constant 0 : i32
    %c0_i32_0 = arith.constant 0 : i32
    %c0_i32_1 = arith.constant 0 : i32
    return %c0_i32, %c0_i32_0 : i32, i32
  }
  func.func @transform_7(%arg0: i32) -> (i32, i32) {
    %c0_i32 = arith.constant 0 : i32
    %c0_i32_0 = arith.constant 0 : i32
    return %arg0, %c0_i32 : i32, i32
  }
}

</mosaic_0001>

<bundles_post_ra>
// kernel: tpu_custom_call.1
= control target key start
LH: loop header
LB: loop body
LE: loop exit
PB: predicated region body
PF: predicated region fallthrough
CT: control target
= control target key end

     0   :  { %12 = vsyncpa [#allocation4], 0  ;;  %s2212_s0 = inlined_call_operand.vmem [shape: f32[3], index: 0, kind: input, shape index: {}]   ;;  %s2213_s1 = inlined_call_operand.vmem [shape: f32[256,156], index: 1, kind: input, shape index: {}]   ;;  %s2214_s2 = inlined_call_operand.vmem [shape: bf16[156,128], index: 2, kind: input, shape index: {}]   ;;  %s2215_s3 = inlined_call_operand.vmem [shape: f32[1,128], index: 3, kind: input, shape index: {}]   ;;  %s2216_s4 = inlined_call_operand.vmem [shape: bf16[128,128], index: 4, kind: input, shape index: {}]   ;;  %s2217_s5 = inlined_call_operand.vmem [shape: f32[1,128], index: 5, kind: input, shape index: {}]   ;;  %s2218_s6 = inlined_call_operand.vmem [shape: f32[1,128], index: 6, kind: input, shape index: {}]   ;;  %s2219_s7 = inlined_call_operand.hbm [shape: f32[2,128], index: 7, kind: output, shape index: {}]  }
   0x1   :  { %13 = vsyncpa [#allocation3], 0  ;;  %s19_s26 = sshll.u32 %s2212_s0, 4  ;;  %s1464_s27 = smov [#allocation2]   ;;  %s20_s26 = int_to_ptr.vmem [resolvable:$true] %s19_s26 }
   0x2   :  { %22 = dma.vmem_to_smem %s20_s26, 16, %s1464_s27, [#allocation4]  }
   0x3   :  { %1460 = dma.done.wait [#allocation4], 16  }
   0x4   :  { %1461 = vsyncadd [#allocation4], 4294967280 }
   0x5   :  { %39 = sfence }
   0x6   :  { %v1390_v0 = vld [vmem:[%s2214_s2 + $0x38] sm:$0xff]  ;;  %v1333_v1 = vld [vmem:[%s2214_s2 + $0x48] sm:$0xf]  ;;  %v1392_v2 = vld [vmem:[%s2214_s2 + $0x48] sm:$0x30]  ;;  %vm272_vm0 = vcmask 1045504  }
   0x7   :  { %v1334_v3 = vor.u32 %v1392_v2, %v1333_v1  ;;  %276 = vmatpush.bf16.msra.mxu0 %v1390_v0  ;;  %v1389_v4 = vld [vmem:[%s2214_s2 + $0x30] sm:$0xff]  ;;  %1401 = vmatpush.bf16.msra.mxu3 %v1390_v0  ;;  %v1391_v6 = vld [vmem:[%s2214_s2 + $0x40] sm:$0xff]  ;;  %v45_v7 = vld [vmem:[%s2213_s1 + $0x8] sm:$0xff]  ;;  %vm223_vm1 = vcmask 228352   ;;  %s41_s15 = sld [smem:[#allocation2]]  ;;  %vm1183_vm2 = vcmask 130112  }
   0x8   :  { %v47_v8 = vld [vmem:[%s2213_s1 + $0x18] sm:$0xff]  ;;  %v1388_v9 = vld [vmem:[%s2214_s2 + $0x28] sm:$0xff]  ;;  %v1387_v11 = vld [vmem:[%s2214_s2 + $0x20] sm:$0xff]  ;;  %s1293_s21 = sld [smem:[#allocation2 + $0x1]]  ;;  %vm1187_vm3 = vcmask 195712   ;;  %vm1191_vm4 = vcmask 261312  }
   0x9   :  { %v274_v5 = vsel %vm272_vm0, %v1334_v3, 0  ;;  %v109_v10 = vpack.c.bf16 %v47_v8, %v45_v7  ;;  %v1386_v12 = vld [vmem:[%s2214_s2 + $0x18] sm:$0xff]  ;;  %v1385_v13 = vld [vmem:[%s2214_s2 + $0x10] sm:$0xff]  ;;  %v49_v14 = vld [vmem:[%s2213_s1 + $0x28] sm:$0xff]  ;;  %vm1195_vm5 = vcmask 326912   ;;  %vm1199_vm6 = vcmask 392512  }
   0xa   :  { %371 = vmatpush.bf16.msra.mxu1 %v274_v5  ;;  %v51_v15 = vld [vmem:[%s2213_s1 + $0x38] sm:$0xff]  ;;  %v1384_v16 = vld [vmem:[%s2214_s2 + $0x8] sm:$0xff]  ;;  %v1383_v18 = vld [vmem:[%s2214_s2] sm:$0xff]  ;;  %vm1203_vm7 = vcmask 458112   ;;  %vm1207_vm8 = vcmask 523712   ;;  %vm1211_vm9 = vcmask 589312  }
   0xb   :  { %277 = vmatpush.bf16.msra.mxu0 %v1389_v4  ;;  %1402 = vmatpush.bf16.msra.mxu3 %v1389_v4  ;;  %v111_v17 = vpack.c.bf16 %v51_v15, %v49_v14  ;;  %v44_v19 = vld [vmem:[%s2213_s1] sm:$0xff]  ;;  %v46_v20 = vld [vmem:[%s2213_s1 + $0x10] sm:$0xff]  ;;  %v53_v22 = vld [vmem:[%s2213_s1 + $0x48] sm:$0xff]  ;;  %vm1215_vm10 = vcmask 654912   ;;  %vm1219_vm11 = vcmask 720512   ;;  %vm1223_vm12 = vcmask 786112  }
   0xc   :  { %v108_v21 = vpack.c.bf16 %v46_v20, %v44_v19  ;;  %v55_v23 = vld [vmem:[%s2213_s1 + $0x58] sm:$0xff]  ;;  %v48_v25 = vld [vmem:[%s2213_s1 + $0x20] sm:$0xff]  ;;  %v50_v26 = vld [vmem:[%s2213_s1 + $0x30] sm:$0xff]  ;;  %vm1227_vm13 = vcmask 851712   ;;  %vm1231_vm14 = vcmask 917312   ;;  %vm1235_vm15 = vcmask 982912  }
   0xd   :  { %v113_v24 = vpack.c.bf16 %v55_v23, %v53_v22  ;;  %v110_v27 = vpack.c.bf16 %v50_v26, %v48_v25  ;;  %v57_v28 = vld [vmem:[%s2213_s1 + $0x68] sm:$0xff]  ;;  %v59_v29 = vld [vmem:[%s2213_s1 + $0x78] sm:$0xff]  ;;  %v52_v31 = vld [vmem:[%s2213_s1 + $0x40] sm:$0xff]  ;;  %vm1239_vm0 = vcmask 1048512   ;;  %s1465_s22 = smov [#allocation5]   ;;  %s1283_s26 = sshll.u32 %s2219_s7, 4  ;;  %s1284_s26 = int_to_ptr.hbm [resolvable:$true] %s1283_s26 }
   0xe   :  { %372 = vmatpush.bf16.msra.mxu1 %v1391_v6  ;;  %v115_v30 = vpack.c.bf16 %v59_v29, %v57_v28  ;;  %v54_v32 = vld [vmem:[%s2213_s1 + $0x50] sm:$0xff]  ;;  %v61_v34 = vld [vmem:[%s2213_s1 + $0x88] sm:$0xff]  ;;  %v63_v35 = vld [vmem:[%s2213_s1 + $0x98] sm:$0xff]  ;;  %s1281_s23 = sshll.u32 %s1465_s22, 4  ;;  %s1282_s23 = int_to_ptr.vmem [resolvable:$true] %s1281_s23 }
   0xf   :  { %278 = vmatpush.bf16.msra.mxu0 %v1388_v9  ;;  %1403 = vmatpush.bf16.msra.mxu3 %v1388_v9  ;;  %v112_v33 = vpack.c.bf16 %v54_v32, %v52_v31  ;;  %v117_v36 = vpack.c.bf16 %v63_v35, %v61_v34  ;;  %v56_v37 = vld [vmem:[%s2213_s1 + $0x60] sm:$0xff]  ;;  %v58_v38 = vld [vmem:[%s2213_s1 + $0x70] sm:$0xff]  ;;  %v65_v40 = vld [vmem:[%s2213_s1 + $0xa8] sm:$0xff] }
  0x10   :  { %v114_v39 = vpack.c.bf16 %v58_v38, %v56_v37  ;;  %v67_v41 = vld [vmem:[%s2213_s1 + $0xb8] sm:$0xff]  ;;  %v60_v43 = vld [vmem:[%s2213_s1 + $0x80] sm:$0xff]  ;;  %v62_v44 = vld [vmem:[%s2213_s1 + $0x90] sm:$0xff] }
  0x11   :  { %1335 = vmatmul.msk.bf16.vlgmr.msra.gmra.mxu1 %vm223_vm1, %v109_v10  ;;  %v119_v42 = vpack.c.bf16 %v67_v41, %v65_v40  ;;  %v92_v45 = vld [vmem:[%s2213_s1 + $0x180] sm:$0xff]  ;;  %v94_v46 = vld [vmem:[%s2213_s1 + $0x190] sm:$0xff]  ;;  %v116_v48 = vpack.c.bf16 %v62_v44, %v60_v43  ;;  %v69_v49 = vld [vmem:[%s2213_s1 + $0xc8] sm:$0xff]  ;;  %v1734_v44 = vstv %s41_s15 }
  0x12   :  { %v132_v47 = vpack.c.bf16 %v94_v46, %v92_v45  ;;  %v71_v50 = vld [vmem:[%s2213_s1 + $0xd8] sm:$0xff]  ;;  %v64_v52 = vld [vmem:[%s2213_s1 + $0xa0] sm:$0xff]  ;;  %v66_v53 = vld [vmem:[%s2213_s1 + $0xb0] sm:$0xff] }
  0x13   :  { %279 = vmatpush.bf16.msra.mxu0 %v1387_v11  ;;  %1404 = vmatpush.bf16.msra.mxu3 %v1387_v11  ;;  %v121_v51 = vpack.c.bf16 %v71_v50, %v69_v49  ;;  %v96_v54 = vld [vmem:[%s2213_s1 + $0x1a0] sm:$0xff]  ;;  %v98_v55 = vld [vmem:[%s2213_s1 + $0x1b0] sm:$0xff]  ;;  %v118_v57 = vpack.c.bf16 %v66_v53, %v64_v52  ;;  %v1400_v58 = vld [vmem:[%s2216_s4 + $0x38] sm:$0xff] }
  0x14   :  { %v134_v56 = vpack.c.bf16 %v98_v55, %v96_v54  ;;  %667 = vmatpush.bf16.msra.mxu2 %v1400_v58  ;;  %v73_v59 = vld [vmem:[%s2213_s1 + $0xe8] sm:$0xff]  ;;  %v75_v60 = vld [vmem:[%s2213_s1 + $0xf8] sm:$0xff]  ;;  %v1399_v61 = vld [vmem:[%s2216_s4 + $0x30] sm:$0xff] }
  0x15   :  { %v123_v62 = vpack.c.bf16 %v75_v60, %v73_v59  ;;  %v68_v63 = vld [vmem:[%s2213_s1 + $0xc0] sm:$0xff]  ;;  %v70_v0 = vld [vmem:[%s2213_s1 + $0xd0] sm:$0xff]  ;;  %v1398_v3 = vld [vmem:[%s2216_s4 + $0x28] sm:$0xff] }
  0x16   :  { %v100_v1 = vld [vmem:[%s2213_s1 + $0x1c0] sm:$0xff]  ;;  %v102_v2 = vld [vmem:[%s2213_s1 + $0x1d0] sm:$0xff]  ;;  %v1396_v7 = vld [vmem:[%s2216_s4 + $0x18] sm:$0xff] }
  0x17   :  { %280 = vmatpush.bf16.msra.mxu0 %v1386_v12  ;;  %1405 = vmatpush.bf16.msra.mxu3 %v1386_v12  ;;  %v136_v4 = vpack.c.bf16 %v102_v2, %v100_v1  ;;  %v77_v8 = vld [vmem:[%s2213_s1 + $0x108] sm:$0xff]  ;;  %v79_v9 = vld [vmem:[%s2213_s1 + $0x118] sm:$0xff]  ;;  %v1395_v10 = vld [vmem:[%s2216_s4 + $0x10] sm:$0xff] }
  0x18   :  { %668 = vmatpush.bf16.msra.mxu2 %v1399_v61  ;;  %v125_v11 = vpack.c.bf16 %v79_v9, %v77_v8  ;;  %v74_v14 = vld [vmem:[%s2213_s1 + $0xf0] sm:$0xff]  ;;  %v104_v15 = vld [vmem:[%s2213_s1 + $0x1e0] sm:$0xff]  ;;  %v81_v22 = vld [vmem:[%s2213_s1 + $0x128] sm:$0xff] }
  0x19   :  { %v1393_v20 = vld [vmem:[%s2216_s4] sm:$0xff]  ;;  %v83_v23 = vld [vmem:[%s2213_s1 + $0x138] sm:$0xff]  ;;  %v101_v28 = vld [vmem:[%s2213_s1 + $0x1c8] sm:$0xff] }
  0x1a   :  { %v76_v26 = vld [vmem:[%s2213_s1 + $0x100] sm:$0xff]  ;;  %v103_v29 = vld [vmem:[%s2213_s1 + $0x1d8] sm:$0xff]  ;;  %v85_v37 = vld [vmem:[%s2213_s1 + $0x148] sm:$0xff] }
  0x1b   :  { %281 = vmatpush.bf16.msra.mxu0 %v1385_v13  ;;  %1406 = vmatpush.bf16.msra.mxu3 %v1385_v13  ;;  %v72_v13 = vld [vmem:[%s2213_s1 + $0xe0] sm:$0xff]  ;;  %v137_v31 = vpack.c.bf16 %v103_v29, %v101_v28  ;;  %v87_v38 = vld [vmem:[%s2213_s1 + $0x158] sm:$0xff]  ;;  %v86_v9 = vld [vmem:[%s2213_s1 + $0x150] sm:$0xff] }
  0x1c   :  { %669 = vmatpush.bf16.msra.mxu2 %v1398_v3  ;;  %v122_v19 = vpack.c.bf16 %v74_v14, %v72_v13  ;;  %v80_v46 = vld [vmem:[%s2213_s1 + $0x120] sm:$0xff]  ;;  %v107_v49 = vld [vmem:[%s2213_s1 + $0x1f8] sm:$0xff] }
  0x1d   :  { %v91_v1 = vld [vmem:[%s2213_s1 + $0x178] sm:$0xff]  ;;  %v84_v8 = vld [vmem:[%s2213_s1 + $0x140] sm:$0xff] }
  0x1e   :  { %v128_v14 = vpack.c.bf16 %v86_v9, %v84_v8 }
  0x1f   :  { %282 = vmatpush.bf16.msra.mxu0 %v1384_v16  ;;  %1407 = vmatpush.bf16.msra.mxu3 %v1384_v16  ;;  %v106_v16 = vld [vmem:[%s2213_s1 + $0x1f0] sm:$0xff] }
  0x21   :  { %1336 = vmatmul.msk.bf16.gmra.mxu1 %vm223_vm1, %v111_v17  ;;  %v1394_v17 = vld [vmem:[%s2216_s4 + $0x8] sm:$0xff] }
  0x23   :  { %283 = vmatpush.bf16.msra.mxu0 %v1383_v18  ;;  %1408 = vmatpush.bf16.msra.mxu3 %v1383_v18  ;;  %v138_v18 = vpack.c.bf16 %v106_v16, %v104_v15 }
  0x26   :  { %284 = vmatmul.bf16.vlgmr.msra.gmra.mxu0 %v108_v21  ;;  %344 = vmatmul.bf16.vlgmr.msra.gmra.mxu3 %v132_v47  ;;  %v82_v47 = vld [vmem:[%s2213_s1 + $0x130] sm:$0xff] }
  0x27   :  { %1409 = vmatpush.bf16.msrb.mxu3 %v274_v5  ;;  %v120_v5 = vpack.c.bf16 %v70_v0, %v68_v63  ;;  %v126_v55 = vpack.c.bf16 %v82_v47, %v80_v46  ;;  %v89_v0 = vld [vmem:[%s2213_s1 + $0x168] sm:$0xff] }
  0x2b   :  { %1410 = vmatpush.bf16.msrb.mxu3 %v1391_v6  ;;  %v1397_v6 = vld [vmem:[%s2216_s4 + $0x20] sm:$0xff] }
  0x2c   :  { %670 = vmatpush.bf16.msra.mxu2 %v1397_v6 }
  0x2f   :  { %1411 = vmatpush.bf16.msra.mxu3 %v1400_v58 }
  0x30   :  { %671 = vmatpush.bf16.msra.mxu2 %v1396_v7 }
  0x31   :  { %1337 = vmatmul.msk.bf16.gmra.mxu1 %vm223_vm1, %v113_v24  ;;  %v127_v24 = vpack.c.bf16 %v83_v23, %v81_v22  ;;  %v93_v23 = vld [vmem:[%s2213_s1 + $0x188] sm:$0xff] }
  0x33   :  { %1412 = vmatpush.bf16.msra.mxu3 %v1399_v61 }
  0x34   :  { %672 = vmatpush.bf16.msra.mxu2 %v1395_v10 }
  0x36   :  { %289 = vmatmul.bf16.gmra.mxu0 %v110_v27  ;;  %349 = vmatmul.bf16.gmra.mxu3 %v134_v56  ;;  %v78_v27 = vld [vmem:[%s2213_s1 + $0x110] sm:$0xff] }
  0x37   :  { %1413 = vmatpush.bf16.msra.mxu3 %v1398_v3  ;;  %v124_v32 = vpack.c.bf16 %v78_v27, %v76_v26 }
  0x38   :  { %673 = vmatpush.bf16.msra.mxu2 %v1394_v17 }
  0x3b   :  { %1414 = vmatpush.bf16.msra.mxu3 %v1397_v6 }
  0x3c   :  { %674 = vmatpush.bf16.msra.mxu2 %v1393_v20 }
  0x3f   :  { %1415 = vmatpush.bf16.msra.mxu3 %v1396_v7 }
  0x41   :  { %1338 = vmatmul.msk.bf16.gmra.mxu1 %vm223_vm1, %v115_v30  ;;  %v1723_v30 = vld [vmem:[%s2215_s3] ss:$0 sm:$0xff] }
  0x43   :  { %1416 = vmatpush.bf16.msra.mxu3 %v1395_v10 }
  0x46   :  { %294 = vmatmul.bf16.gmra.mxu0 %v112_v33  ;;  %354 = vmatmul.bf16.gmra.mxu3 %v136_v4 }
  0x47   :  { %1417 = vmatpush.bf16.msra.mxu3 %v1394_v17 }
  0x4b   :  { %1418 = vmatpush.bf16.msra.mxu3 %v1393_v20 }
  0x51   :  { %1339 = vmatmul.msk.bf16.gmra.mxu1 %vm223_vm1, %v117_v36 }
  0x56   :  { %299 = vmatmul.bf16.gmra.mxu0 %v114_v39  ;;  %359 = vmatmul.bf16.gmra.mxu3 %v138_v18 }
  0x61   :  { %1340 = vmatmul.msk.bf16.gmra.mxu1 %vm223_vm1, %v119_v42  ;;  %v129_v42 = vpack.c.bf16 %v87_v38, %v85_v37 }
  0x66   :  { %304 = vmatmul.bf16.gmra.mxu0 %v116_v48  ;;  %1349 = vmatmul.msk.bf16.vlgmr.msrb.gmra.mxu3 %vm223_vm1, %v137_v31  ;;  %v105_v48 = vld [vmem:[%s2213_s1 + $0x1e8] sm:$0xff] }
  0x67   :  { %v139_v52 = vpack.c.bf16 %v107_v49, %v105_v48  ;;  %v97_v48 = vld [vmem:[%s2213_s1 + $0x1a8] sm:$0xff]  ;;  %v99_v49 = vld [vmem:[%s2213_s1 + $0x1b8] sm:$0xff] }
  0x71   :  { %1341 = vmatmul.msk.bf16.gmra.mxu1 %vm223_vm1, %v121_v51 }
  0x76   :  { %309 = vmatmul.bf16.gmra.mxu0 %v118_v57  ;;  %1350 = vmatmul.msk.bf16.gmra.mxu3 %vm223_vm1, %v139_v52 }
  0x81   :  { %1342 = vmatmul.msk.bf16.gmra.mxu1 %vm223_vm1, %v123_v62 }
  0x86   :  { %314 = vmatmul.bf16.gmra.mxu0 %v120_v5  ;;  %v131_v5 = vpack.c.bf16 %v91_v1, %v89_v0 }
  0x8e   :  { %v374_v12 = vpop.f32.mrf.mxu1 }
  0x91   :  { %1343 = vmatmul.msk.bf16.gmra.mxu1 %vm223_vm1, %v125_v11 }
  0x96   :  { %v376_v21 = vpop.f32.mrf.mxu1  ;;  %319 = vmatmul.bf16.gmra.mxu0 %v122_v19 }
  0x9e   :  { %v379_v25 = vpop.f32.mrf.mxu1 }
  0xa1   :  { %1344 = vmatmul.msk.bf16.gmra.mxu1 %vm223_vm1, %v127_v24  ;;  %v95_v24 = vld [vmem:[%s2213_s1 + $0x198] sm:$0xff] }
  0xa2   :  { %v133_v28 = vpack.c.bf16 %v95_v24, %v93_v23 }
  0xa3   :  { %v285_v33 = vpop.f32.mrf.mxu0 }
  0xa4   :  { %v286_v34 = vadd.f32 %v1723_v30, %v285_v33  ;;  %v90_v33 = vld [vmem:[%s2213_s1 + $0x170] sm:$0xff] }
  0xa6   :  { %v381_v35 = vpop.f32.mrf.mxu1  ;;  %324 = vmatmul.bf16.gmra.mxu0 %v124_v32  ;;  %v375_v36 = vadd.f32 %v374_v12, %v286_v34  ;;  %v88_v32 = vld [vmem:[%s2213_s1 + $0x160] sm:$0xff] }
  0xa7   :  { %v130_v38 = vpack.c.bf16 %v90_v33, %v88_v32 }
  0xa8   :  { %v486_v40 = vmin.f32 %v375_v36, 0.0  ;;  %v454_v53 = vmax.f32 %v375_v36, 0.0 }
  0xaa   :  { %v519_v51 = vmul.f32 %v1734_v44, %v486_v40 }
  0xab   :  { %v287_v39 = vpop.f32.mrf.mxu0 }
  0xac   :  { %v288_v41 = vadd.f32 %v1723_v30, %v287_v39  ;;  %v551_v59 = vadd.f32 %v519_v51, %v454_v53  ;;  %v135_v53 = vpack.c.bf16 %v99_v49, %v97_v48 }
  0xae   :  { %v384_v43 = vpop.f32.mrf.mxu1  ;;  %v377_v45 = vadd.f32 %v376_v21, %v288_v41 }
  0xb0   :  { %v487_v50 = vmin.f32 %v377_v45, 0.0  ;;  %v455_v54 = vmax.f32 %v377_v45, 0.0 }
  0xb1   :  { %1345 = vmatmul.msk.bf16.gmra.mxu1 %vm223_vm1, %v129_v42 }
  0xb2   :  { %v520_v56 = vmul.f32 %v1734_v44, %v487_v50 }
  0xb3   :  { %v290_v57 = vpop.f32.mrf.mxu0 }
  0xb4   :  { %v291_v58 = vadd.f32 %v1723_v30, %v290_v57  ;;  %v552_v60 = vadd.f32 %v520_v56, %v455_v54 }
  0xb6   :  { %v386_v61 = vpop.f32.mrf.mxu1  ;;  %329 = vmatmul.bf16.gmra.mxu0 %v126_v55  ;;  %v583_v62 = vpack.c.bf16 %v552_v60, %v551_v59  ;;  %v380_v63 = vadd.f32 %v379_v25, %v291_v58 }
  0xb8   :  { %675 = vmatmul.bf16.vlgmr.msra.gmra.mxu2 %v583_v62  ;;  %v488_v3 = vmin.f32 %v380_v63, 0.0  ;;  %v456_v12 = vmax.f32 %v380_v63, 0.0 }
  0xba   :  { %v521_v11 = vmul.f32 %v1734_v44, %v488_v3 }
  0xbb   :  { %v292_v2 = vpop.f32.mrf.mxu0 }
  0xbc   :  { %v293_v4 = vadd.f32 %v1723_v30, %v292_v2  ;;  %v553_v18 = vadd.f32 %v521_v11, %v456_v12 }
  0xbe   :  { %v389_v6 = vpop.f32.mrf.mxu1  ;;  %v382_v7 = vadd.f32 %v381_v35, %v293_v4 }
  0xc0   :  { %v489_v10 = vmin.f32 %v382_v7, 0.0  ;;  %v457_v13 = vmax.f32 %v382_v7, 0.0 }
  0xc1   :  { %1346 = vmatmul.msk.bf16.gmra.mxu1 %vm223_vm1, %v131_v5 }
  0xc2   :  { %v522_v15 = vmul.f32 %v1734_v44, %v489_v10 }
  0xc3   :  { %v295_v16 = vpop.f32.mrf.mxu0 }
  0xc4   :  { %v296_v17 = vadd.f32 %v1723_v30, %v295_v16  ;;  %v554_v19 = vadd.f32 %v522_v15, %v457_v13 }
  0xc6   :  { %v391_v20 = vpop.f32.mrf.mxu1  ;;  %334 = vmatmul.bf16.gmra.mxu0 %v128_v14  ;;  %v584_v21 = vpack.c.bf16 %v554_v19, %v553_v18  ;;  %v385_v22 = vadd.f32 %v384_v43, %v296_v17 }
  0xc8   :  { %680 = vmatmul.bf16.gmra.mxu2 %v584_v21  ;;  %v490_v26 = vmin.f32 %v385_v22, 0.0  ;;  %v458_v36 = vmax.f32 %v385_v22, 0.0 }
  0xca   :  { %v523_v35 = vmul.f32 %v1734_v44, %v490_v26 }
  0xcb   :  { %v297_v25 = vpop.f32.mrf.mxu0 }
  0xcc   :  { %v298_v27 = vadd.f32 %v1723_v30, %v297_v25  ;;  %v555_v42 = vadd.f32 %v523_v35, %v458_v36 }
  0xce   :  { %v394_v29 = vpop.f32.mrf.mxu1  ;;  %v387_v31 = vadd.f32 %v386_v61, %v298_v27 }
  0xd0   :  { %v491_v34 = vmin.f32 %v387_v31, 0.0  ;;  %v459_v37 = vmax.f32 %v387_v31, 0.0 }
  0xd1   :  { %1347 = vmatmul.msk.bf16.gmra.mxu1 %vm223_vm1, %v133_v28 }
  0xd2   :  { %v524_v39 = vmul.f32 %v1734_v44, %v491_v34 }
  0xd3   :  { %v300_v40 = vpop.f32.mrf.mxu0 }
  0xd4   :  { %v301_v41 = vadd.f32 %v1723_v30, %v300_v40  ;;  %v556_v43 = vadd.f32 %v524_v39, %v459_v37 }
  0xd6   :  { %v396_v45 = vpop.f32.mrf.mxu1  ;;  %339 = vmatmul.bf16.gmra.mxu0 %v130_v38  ;;  %v585_v46 = vpack.c.bf16 %v556_v43, %v555_v42  ;;  %v390_v47 = vadd.f32 %v389_v6, %v301_v41  ;;  %v1807_v43 = vpop.f32.mrf.mxu3 }
  0xd8   :  { %685 = vmatmul.bf16.gmra.mxu2 %v585_v46  ;;  %v492_v51 = vmin.f32 %v390_v47, 0.0  ;;  %v460_v58 = vmax.f32 %v390_v47, 0.0 }
  0xda   :  { %v525_v57 = vmul.f32 %v1734_v44, %v492_v51 }
  0xdb   :  { %v302_v50 = vpop.f32.mrf.mxu0 }
  0xdc   :  { %v303_v52 = vadd.f32 %v1723_v30, %v302_v50  ;;  %v557_v63 = vadd.f32 %v525_v57, %v460_v58 }
  0xde   :  { %v399_v54 = vpop.f32.mrf.mxu1  ;;  %v392_v55 = vadd.f32 %v391_v20, %v303_v52  ;;  %v1812_v57 = vpop.f32.mrf.mxu3 }
  0xe0   :  { %v493_v56 = vmin.f32 %v392_v55, 0.0  ;;  %v461_v59 = vmax.f32 %v392_v55, 0.0 }
  0xe1   :  { %1348 = vmatmul.msk.bf16.gmra.mxu1 %vm223_vm1, %v135_v53  ;;  %vm1272_vm1 = vcmask 1041409  }
  0xe2   :  { %v526_v60 = vmul.f32 %v1734_v44, %v493_v56 }
  0xe3   :  { %v305_v61 = vpop.f32.mrf.mxu0 }
  0xe4   :  { %v306_v62 = vadd.f32 %v1723_v30, %v305_v61  ;;  %v558_v0 = vadd.f32 %v526_v60, %v461_v59 }
  0xe6   :  { %v401_v1 = vpop.f32.mrf.mxu1  ;;  %v586_v2 = vpack.c.bf16 %v558_v0, %v557_v63  ;;  %v395_v3 = vadd.f32 %v394_v29, %v306_v62 }
  0xe8   :  { %690 = vmatmul.bf16.gmra.mxu2 %v586_v2  ;;  %v494_v5 = vmin.f32 %v395_v3, 0.0  ;;  %v462_v11 = vmax.f32 %v395_v3, 0.0  ;;  %v1816_v3 = vpop.f32.mrf.mxu3 }
  0xea   :  { %v527_v10 = vmul.f32 %v1734_v44, %v494_v5 }
  0xeb   :  { %v307_v4 = vpop.f32.mrf.mxu0 }
  0xec   :  { %v308_v6 = vadd.f32 %v1723_v30, %v307_v4  ;;  %v559_v16 = vadd.f32 %v527_v10, %v462_v11 }
  0xee   :  { %v404_v7 = vpop.f32.mrf.mxu1  ;;  %v397_v8 = vadd.f32 %v396_v45, %v308_v6 }
  0xf0   :  { %v495_v9 = vmin.f32 %v397_v8, 0.0  ;;  %v463_v12 = vmax.f32 %v397_v8, 0.0 }
  0xf2   :  { %v528_v13 = vmul.f32 %v1734_v44, %v495_v9 }
  0xf3   :  { %v310_v14 = vpop.f32.mrf.mxu0 }
  0xf4   :  { %v311_v15 = vadd.f32 %v1723_v30, %v310_v14  ;;  %v560_v17 = vadd.f32 %v528_v13, %v463_v12  ;;  %v1820_v14 = vpop.f32.mrf.mxu3 }
  0xf6   :  { %v406_v18 = vpop.f32.mrf.mxu1  ;;  %v587_v19 = vpack.c.bf16 %v560_v17, %v559_v16  ;;  %v400_v20 = vadd.f32 %v399_v54, %v311_v15 }
  0xf8   :  { %695 = vmatmul.bf16.gmra.mxu2 %v587_v19  ;;  %v496_v22 = vmin.f32 %v400_v20, 0.0  ;;  %v464_v28 = vmax.f32 %v400_v20, 0.0 }
  0xfa   :  { %v529_v27 = vmul.f32 %v1734_v44, %v496_v22 }
  0xfb   :  { %v312_v21 = vpop.f32.mrf.mxu0 }
  0xfc   :  { %v313_v23 = vadd.f32 %v1723_v30, %v312_v21  ;;  %v561_v34 = vadd.f32 %v529_v27, %v464_v28 }
  0xfe   :  { %v409_v24 = vpop.f32.mrf.mxu1  ;;  %v402_v25 = vadd.f32 %v401_v1, %v313_v23 }
 0x100   :  { %v497_v26 = vmin.f32 %v402_v25, 0.0  ;;  %v465_v29 = vmax.f32 %v402_v25, 0.0 }
 0x102   :  { %v530_v31 = vmul.f32 %v1734_v44, %v497_v26 }
 0x103   :  { %v315_v32 = vpop.f32.mrf.mxu0 }
 0x104   :  { %v316_v33 = vadd.f32 %v1723_v30, %v315_v32  ;;  %v562_v35 = vadd.f32 %v530_v31, %v465_v29  ;;  %v1826_v29 = vpop.f32.mrf.mxu3 }
 0x106   :  { %v411_v36 = vpop.f32.mrf.mxu1  ;;  %v588_v37 = vpack.c.bf16 %v562_v35, %v561_v34  ;;  %v405_v38 = vadd.f32 %v404_v7, %v316_v33  ;;  %v1831_v33 = vld [vmem:[%s2217_s5] ss:$0 sm:$0xff] }
 0x108   :  { %700 = vmatmul.bf16.gmra.mxu2 %v588_v37  ;;  %v498_v40 = vmin.f32 %v405_v38, 0.0  ;;  %v466_v48 = vmax.f32 %v405_v38, 0.0 }
 0x10a   :  { %v531_v47 = vmul.f32 %v1734_v44, %v498_v40 }
 0x10b   :  { %v317_v39 = vpop.f32.mrf.mxu0 }
 0x10c   :  { %v318_v41 = vadd.f32 %v1723_v30, %v317_v39  ;;  %v563_v53 = vadd.f32 %v531_v47, %v466_v48  ;;  %v1843_v48 = vld [vmem:[%s2218_s6] ss:$0 sm:$0xff]  ;;  %s1294_s6 = sld [smem:[#allocation2 + $0x2]] }
 0x10e   :  { %v414_v42 = vpop.f32.mrf.mxu1  ;;  %v407_v45 = vadd.f32 %v406_v18, %v318_v41 }
 0x110   :  { %v499_v46 = vmin.f32 %v407_v45, 0.0  ;;  %v467_v49 = vmax.f32 %v407_v45, 0.0 }
 0x112   :  { %v532_v50 = vmul.f32 %v1734_v44, %v499_v46 }
 0x113   :  { %v320_v51 = vpop.f32.mrf.mxu0 }
 0x114   :  { %v321_v52 = vadd.f32 %v1723_v30, %v320_v51  ;;  %v564_v54 = vadd.f32 %v532_v50, %v467_v49 }
 0x116   :  { %v416_v55 = vpop.f32.mrf.mxu1  ;;  %v589_v56 = vpack.c.bf16 %v564_v54, %v563_v53  ;;  %v410_v58 = vadd.f32 %v409_v24, %v321_v52 }
 0x118   :  { %705 = vmatmul.bf16.gmra.mxu2 %v589_v56  ;;  %v500_v60 = vmin.f32 %v410_v58, 0.0  ;;  %v468_v2 = vmax.f32 %v410_v58, 0.0 }
 0x11a   :  { %v533_v1 = vmul.f32 %v1734_v44, %v500_v60 }
 0x11b   :  { %v322_v59 = vpop.f32.mrf.mxu0 }
 0x11c   :  { %v323_v61 = vadd.f32 %v1723_v30, %v322_v59  ;;  %v565_v8 = vadd.f32 %v533_v1, %v468_v2 }
 0x11e   :  { %v419_v62 = vpop.f32.mrf.mxu1  ;;  %v412_v63 = vadd.f32 %v411_v36, %v323_v61 }
 0x120   :  { %v501_v0 = vmin.f32 %v412_v63, 0.0  ;;  %v469_v4 = vmax.f32 %v412_v63, 0.0 }
 0x122   :  { %v534_v5 = vmul.f32 %v1734_v44, %v501_v0 }
 0x123   :  { %v325_v6 = vpop.f32.mrf.mxu0 }
 0x124   :  { %v326_v7 = vadd.f32 %v1723_v30, %v325_v6  ;;  %v566_v9 = vadd.f32 %v534_v5, %v469_v4 }
 0x126   :  { %v421_v10 = vpop.f32.mrf.mxu1  ;;  %v590_v11 = vpack.c.bf16 %v566_v9, %v565_v8  ;;  %v415_v12 = vadd.f32 %v414_v42, %v326_v7  ;;  %v1837_v42 = vpop.f32.mrf.mxu3 }
 0x128   :  { %710 = vmatmul.bf16.gmra.mxu2 %v590_v11  ;;  %v502_v15 = vmin.f32 %v415_v12, 0.0  ;;  %v470_v21 = vmax.f32 %v415_v12, 0.0 }
 0x12a   :  { %v535_v20 = vmul.f32 %v1734_v44, %v502_v15 }
 0x12b   :  { %v327_v13 = vpop.f32.mrf.mxu0 }
 0x12c   :  { %v328_v16 = vadd.f32 %v1723_v30, %v327_v13  ;;  %v567_v26 = vadd.f32 %v535_v20, %v470_v21 }
 0x12e   :  { %v424_v17 = vpop.f32.mrf.mxu1  ;;  %v417_v18 = vadd.f32 %v416_v55, %v328_v16  ;;  %v1853_v5 = vpop.f32.mrf.mxu3 }
 0x130   :  { %v503_v19 = vmin.f32 %v417_v18, 0.0  ;;  %v471_v22 = vmax.f32 %v417_v18, 0.0  ;;  %v346_v18 = vadd.f32 %v1723_v30, %v1807_v43 }
 0x132   :  { %v536_v23 = vmul.f32 %v1734_v44, %v503_v19 }
 0x133   :  { %v330_v24 = vpop.f32.mrf.mxu0 }
 0x134   :  { %v331_v25 = vadd.f32 %v1723_v30, %v330_v24  ;;  %v568_v27 = vadd.f32 %v536_v23, %v471_v22 }
 0x136   :  { %v426_v28 = vpop.f32.mrf.mxu1  ;;  %v591_v31 = vpack.c.bf16 %v568_v27, %v567_v26  ;;  %v420_v32 = vadd.f32 %v419_v62, %v331_v25 }
 0x138   :  { %715 = vmatmul.bf16.gmra.mxu2 %v591_v31  ;;  %v504_v36 = vmin.f32 %v420_v32, 0.0  ;;  %v472_v50 = vmax.f32 %v420_v32, 0.0  ;;  %v1865_v32 = vpop.f32.mrf.mxu3 }
 0x13a   :  { %v537_v49 = vmul.f32 %v1734_v44, %v504_v36 }
 0x13b   :  { %v332_v34 = vpop.f32.mrf.mxu0  ;;  %v676_v35 = vpop.f32.mrf.mxu2 }
 0x13c   :  { %v333_v37 = vadd.f32 %v1723_v30, %v332_v34  ;;  %v677_v38 = vadd.f32 %v1831_v33, %v676_v35  ;;  %v569_v59 = vadd.f32 %v537_v49, %v472_v50 }
 0x13e   :  { %v1835_v39 = vpop.f32.mrf.mxu1  ;;  %v422_v40 = vadd.f32 %v421_v10, %v333_v37  ;;  %v788_v41 = vmin.f32 %v677_v38, 0.0  ;;  %v756_v46 = vmax.f32 %v677_v38, 0.0 }
 0x140   :  { %v505_v45 = vmin.f32 %v422_v40, 0.0  ;;  %v820_v47 = vmul.f32 %v788_v41, %v1734_v44  ;;  %v473_v51 = vmax.f32 %v422_v40, 0.0 }
 0x142   :  { %v852_v52 = vadd.f32 %v820_v47, %v756_v46  ;;  %v538_v53 = vmul.f32 %v1734_v44, %v505_v45 }
 0x143   :  { %v335_v54 = vpop.f32.mrf.mxu0  ;;  %v678_v55 = vpop.f32.mrf.mxu2 }
 0x144   :  { %v679_v56 = vadd.f32 %v1831_v33, %v678_v55  ;;  %v888_v58 = vmul.f32 %v1843_v48, %v852_v52  ;;  %v570_v60 = vadd.f32 %v538_v53, %v473_v51  ;;  %v336_v61 = vadd.f32 %v1723_v30, %v335_v54 }
 0x146   :  { %v1850_v62 = vpop.f32.mrf.mxu1  ;;  %v789_v63 = vmin.f32 %v679_v56, 0.0  ;;  %920 = vadd.xlane.f32.xlu0 %v888_v58  ;;  %v592_v0 = vpack.c.bf16 %v570_v60, %v569_v59  ;;  %v757_v1 = vmax.f32 %v679_v56, 0.0  ;;  %v425_v4 = vadd.f32 %v424_v17, %v336_v61 }
 0x148   :  { %v821_v2 = vmul.f32 %v789_v63, %v1734_v44  ;;  %720 = vmatmul.bf16.gmra.mxu2 %v592_v0  ;;  %v506_v12 = vmin.f32 %v425_v4, 0.0  ;;  %v474_v25 = vmax.f32 %v425_v4, 0.0  ;;  %v444_v4 = vpop.f32.mrf.mxu3 }
 0x14a   :  { %v853_v6 = vadd.f32 %v821_v2, %v757_v1  ;;  %v539_v22 = vmul.f32 %v1734_v44, %v506_v12  ;;  %v351_v2 = vadd.f32 %v1723_v30, %v1816_v3  ;;  %v353_v3 = vadd.f32 %v1723_v30, %v1820_v14 }
 0x14b   :  { %v337_v7 = vpop.f32.mrf.mxu0  ;;  %v681_v8 = vpop.f32.mrf.mxu2 }
 0x14c   :  { %v338_v9 = vadd.f32 %v1723_v30, %v337_v7  ;;  %v682_v10 = vadd.f32 %v1831_v33, %v681_v8  ;;  %v889_v11 = vmul.f32 %v1843_v48, %v853_v6  ;;  %v571_v40 = vadd.f32 %v539_v22, %v474_v25 }
 0x14e   :  { %v434_v13 = vpop.f32.mrf.mxu1  ;;  %v427_v15 = vadd.f32 %v426_v28, %v338_v9  ;;  %v790_v16 = vmin.f32 %v682_v10, 0.0  ;;  %922 = vadd.xlane.f32.xlu0 %v889_v11  ;;  %v758_v19 = vmax.f32 %v682_v10, 0.0  ;;  %v348_v28 = vadd.f32 %v1723_v30, %v1812_v57 }
 0x14f   :  { %v435_v20 = vadd.f32 %v434_v13, %v346_v18 }
 0x150   :  { %v507_v17 = vmin.f32 %v427_v15, 0.0  ;;  %v822_v21 = vmul.f32 %v790_v16, %v1734_v44  ;;  %v475_v23 = vmax.f32 %v427_v15, 0.0 }
 0x151   :  { %v510_v36 = vmin.f32 %v435_v20, 0.0  ;;  %v478_v53 = vmax.f32 %v435_v20, 0.0 }
 0x152   :  { %v540_v24 = vmul.f32 %v1734_v44, %v507_v17  ;;  %v854_v31 = vadd.f32 %v822_v21, %v758_v19 }
 0x153   :  { %v340_v26 = vpop.f32.mrf.mxu0  ;;  %v683_v27 = vpop.f32.mrf.mxu2  ;;  %v543_v50 = vmul.f32 %v1734_v44, %v510_v36 }
 0x154   :  { %v341_v43 = vadd.f32 %v1723_v30, %v340_v26  ;;  %v684_v34 = vadd.f32 %v1831_v33, %v683_v27  ;;  %v572_v35 = vadd.f32 %v540_v24, %v475_v23  ;;  %v890_v38 = vmul.f32 %v1843_v48, %v854_v31  ;;  %v446_v31 = vpop.f32.mrf.mxu3 }
 0x155   :  { %v575_v63 = vadd.f32 %v543_v50, %v478_v53 }
 0x156   :  { %v436_v37 = vpop.f32.mrf.mxu1  ;;  %v791_v41 = vmin.f32 %v684_v34, 0.0  ;;  %924 = vadd.xlane.f32.xlu1 %v890_v38  ;;  %v593_v46 = vpack.c.bf16 %v572_v35, %v571_v40  ;;  %v430_v47 = vadd.f32 %v1835_v39, %v341_v43  ;;  %v759_v49 = vmax.f32 %v684_v34, 0.0 }
 0x157   :  { %v437_v45 = vadd.f32 %v436_v37, %v348_v28  ;;  %v356_v40 = vadd.f32 %v1723_v30, %v1826_v29 }
 0x158   :  { %v823_v57 = vmul.f32 %v791_v41, %v1734_v44  ;;  %725 = vmatmul.bf16.gmra.mxu2 %v593_v46  ;;  %v508_v59 = vmin.f32 %v430_v47, 0.0  ;;  %v476_v15 = vmax.f32 %v430_v47, 0.0  ;;  %v358_v41 = vadd.f32 %v1723_v30, %v1837_v42 }
 0x159   :  { %v511_v51 = vmin.f32 %v437_v45, 0.0  ;;  %v479_v54 = vmax.f32 %v437_v45, 0.0 }
 0x15a   :  { %v855_v52 = vadd.f32 %v823_v57, %v759_v49  ;;  %v541_v11 = vmul.f32 %v1734_v44, %v508_v59  ;;  %v447_v53 = vadd.f32 %v446_v31, %v358_v41 }
 0x15b   :  { %v544_v55 = vmul.f32 %v1734_v44, %v511_v51  ;;  %v342_v56 = vpop.f32.mrf.mxu0  ;;  %v686_v58 = vpop.f32.mrf.mxu2 }
 0x15c   :  { %v343_v60 = vadd.f32 %v1723_v30, %v342_v56  ;;  %v687_v61 = vadd.f32 %v1831_v33, %v686_v58  ;;  %v891_v39 = vmul.f32 %v1843_v48, %v855_v52  ;;  %v573_v21 = vadd.f32 %v541_v11, %v476_v15  ;;  %v449_v29 = vpop.f32.mrf.mxu3 }
 0x15d   :  { %v576_v0 = vadd.f32 %v544_v55, %v479_v54  ;;  %v445_v52 = vadd.f32 %v444_v4, %v356_v40  ;;  %v515_v42 = vmin.f32 %v447_v53, 0.0 }
 0x15e   :  { %v439_v1 = vpop.f32.mrf.mxu1  ;;  %v432_v6 = vadd.f32 %v1850_v62, %v343_v60  ;;  %v792_v7 = vmin.f32 %v687_v61, 0.0  ;;  %926 = vadd.xlane.f32.xlu1 %v891_v39  ;;  %v760_v12 = vmax.f32 %v687_v61, 0.0 }
 0x15f   :  { %v595_v8 = vpack.c.bf16 %v576_v0, %v575_v63  ;;  %v440_v10 = vadd.f32 %v439_v1, %v351_v2  ;;  %v514_v58 = vmin.f32 %v445_v52, 0.0  ;;  %v482_v63 = vmax.f32 %v445_v52, 0.0 }
 0x160   :  { %v509_v9 = vmin.f32 %v432_v6, 0.0  ;;  %v824_v13 = vmul.f32 %v792_v7, %v1734_v44  ;;  %v477_v16 = vmax.f32 %v432_v6, 0.0  ;;  %v483_v1 = vmax.f32 %v447_v53, 0.0 }
 0x161   :  { %735 = vmatmul.bf16.vlgmr.msra.gmra.mxu3 %v595_v8  ;;  %v512_v19 = vmin.f32 %v440_v10, 0.0  ;;  %v480_v35 = vmax.f32 %v440_v10, 0.0  ;;  %v547_v0 = vmul.f32 %v1734_v44, %v514_v58  ;;  %v548_v2 = vmul.f32 %v1734_v44, %v515_v42 }
 0x162   :  { %v542_v18 = vmul.f32 %v1734_v44, %v509_v9  ;;  %v856_v62 = vadd.f32 %v824_v13, %v760_v12  ;;  %v361_v8 = vadd.f32 %v1723_v30, %v1853_v5  ;;  %v363_v9 = vadd.f32 %v1723_v30, %v1865_v32 }
 0x163   :  { %v688_v17 = vpop.f32.mrf.mxu2  ;;  %v545_v28 = vmul.f32 %v1734_v44, %v512_v19  ;;  %v579_v11 = vadd.f32 %v547_v0, %v482_v63  ;;  %v580_v12 = vadd.f32 %v548_v2, %v483_v1 }
 0x164   :  { %v689_v20 = vadd.f32 %v1831_v33, %v688_v17  ;;  %v574_v22 = vadd.f32 %v542_v18, %v477_v16  ;;  %v892_v24 = vmul.f32 %v1843_v48, %v856_v62  ;;  %v451_v13 = vpop.f32.mrf.mxu3 }
 0x165   :  { %v577_v49 = vadd.f32 %v545_v28, %v480_v35  ;;  %v452_v17 = vadd.f32 %v451_v13, %v363_v9  ;;  %v597_v62 = vpack.c.bf16 %v580_v12, %v579_v11 }
 0x166   :  { %v441_v23 = vpop.f32.mrf.mxu1  ;;  %v793_v25 = vmin.f32 %v689_v20, 0.0  ;;  %v594_v27 = vpack.c.bf16 %v574_v22, %v573_v21  ;;  %928 = vadd.xlane.f32.xlu2 %v892_v24  ;;  %v761_v43 = vmax.f32 %v689_v20, 0.0 }
 0x167   :  { %v442_v26 = vadd.f32 %v441_v23, %v353_v3  ;;  %v450_v3 = vadd.f32 %v449_v29, %v361_v8  ;;  %v517_v30 = vmin.f32 %v452_v17, 0.0 }
 0x168   :  { %v825_v14 = vmul.f32 %v793_v25, %v1734_v44  ;;  %730 = vmatmul.bf16.gmra.mxu2 %v594_v27  ;;  %v485_v27 = vmax.f32 %v452_v17, 0.0 }
 0x169   :  { %v513_v34 = vmin.f32 %v442_v26, 0.0  ;;  %v481_v36 = vmax.f32 %v442_v26, 0.0  ;;  %v516_v21 = vmin.f32 %v450_v3, 0.0  ;;  %v484_v25 = vmax.f32 %v450_v3, 0.0 }
 0x16a   :  { %v857_v38 = vadd.f32 %v825_v14, %v761_v43  ;;  %v550_v31 = vmul.f32 %v1734_v44, %v517_v30 }
 0x16b   :  { %v546_v37 = vmul.f32 %v1734_v44, %v513_v34  ;;  %v691_v45 = vpop.f32.mrf.mxu2  ;;  %v549_v26 = vmul.f32 %v1734_v44, %v516_v21 }
 0x16c   :  { %v692_v46 = vadd.f32 %v1831_v33, %v691_v45  ;;  %v893_v47 = vmul.f32 %v1843_v48, %v857_v38 }
 0x16d   :  { %v578_v57 = vadd.f32 %v546_v37, %v481_v36  ;;  %v581_v35 = vadd.f32 %v549_v26, %v484_v25  ;;  %v582_v36 = vadd.f32 %v550_v31, %v485_v27  ;;  %v1178_v26 = vlaneseq }
 0x16e   :  { %v794_v50 = vmin.f32 %v692_v46, 0.0  ;;  %930 = vadd.xlane.f32.xlu2 %v893_v47  ;;  %v762_v54 = vmax.f32 %v692_v46, 0.0 }
 0x16f   :  { %v596_v51 = vpack.c.bf16 %v578_v57, %v577_v49  ;;  %v598_v41 = vpack.c.bf16 %v582_v36, %v581_v35  ;;  %v1944_v35 = vand.u32 127, %v1178_v26 }
 0x170   :  { %v826_v55 = vmul.f32 %v794_v50, %v1734_v44 }
 0x171   :  { %740 = vmatmul.bf16.gmra.mxu3 %v596_v51 }
 0x172   :  { %v858_v56 = vadd.f32 %v826_v55, %v762_v54 }
 0x173   :  { %v693_v59 = vpop.f32.mrf.mxu2 }
 0x174   :  { %v694_v60 = vadd.f32 %v1831_v33, %v693_v59  ;;  %v894_v61 = vmul.f32 %v1843_v48, %v858_v56 }
 0x176   :  { %v795_v39 = vmin.f32 %v694_v60, 0.0  ;;  %932 = vadd.xlane.f32.xlu0 %v894_v61  ;;  %v763_v4 = vmax.f32 %v694_v60, 0.0 }
 0x178   :  { %v827_v6 = vmul.f32 %v795_v39, %v1734_v44 }
 0x17a   :  { %v859_v7 = vadd.f32 %v827_v6, %v763_v4 }
 0x17b   :  { %v696_v10 = vpop.f32.mrf.mxu2 }
 0x17c   :  { %v697_v15 = vadd.f32 %v1831_v33, %v696_v10  ;;  %v895_v16 = vmul.f32 %v1843_v48, %v859_v7 }
 0x17e   :  { %v796_v18 = vmin.f32 %v697_v15, 0.0  ;;  %934 = vadd.xlane.f32.xlu1 %v895_v16  ;;  %v764_v19 = vmax.f32 %v697_v15, 0.0 }
 0x180   :  { %v828_v20 = vmul.f32 %v796_v18, %v1734_v44 }
 0x181   :  { %745 = vmatmul.bf16.gmra.mxu3 %v597_v62  ;;  %v1933_v62 = vstv %s1294_s6 }
 0x182   :  { %v860_v5 = vadd.f32 %v828_v20, %v764_v19 }
 0x183   :  { %v698_v32 = vpop.f32.mrf.mxu2 }
 0x184   :  { %v699_v22 = vadd.f32 %v1831_v33, %v698_v32  ;;  %v896_v23 = vmul.f32 %v1843_v48, %v860_v5 }
 0x186   :  { %v797_v24 = vmin.f32 %v699_v22, 0.0  ;;  %936 = vadd.xlane.f32.xlu2 %v896_v23  ;;  %v765_v28 = vmax.f32 %v699_v22, 0.0 }
 0x188   :  { %v829_v43 = vmul.f32 %v797_v24, %v1734_v44 }
 0x18a   :  { %v861_v14 = vadd.f32 %v829_v43, %v765_v28  ;;  %v1940_v28 = vstv %s1293_s21 }
 0x18b   :  { %v701_v34 = vpop.f32.mrf.mxu2 }
 0x18c   :  { %v702_v37 = vadd.f32 %v1831_v33, %v701_v34  ;;  %v897_v38 = vmul.f32 %v1843_v48, %v861_v14 }
 0x18e   :  { %v798_v40 = vmin.f32 %v702_v37, 0.0  ;;  %938 = vadd.xlane.f32.xlu0 %v897_v38  ;;  %v766_v45 = vmax.f32 %v702_v37, 0.0 }
 0x190   :  { %v830_v46 = vmul.f32 %v798_v40, %v1734_v44 }
 0x191   :  { %750 = vmatmul.bf16.gmra.mxu3 %v598_v41  ;;  %v1948_v41 = vadd.s32 4294967288, %v1944_v35 }
 0x192   :  { %v862_v47 = vadd.f32 %v830_v46, %v766_v45 }
 0x193   :  { %v703_v49 = vpop.f32.mrf.mxu2 }
 0x194   :  { %v704_v57 = vadd.f32 %v1831_v33, %v703_v49  ;;  %v898_v50 = vmul.f32 %v1843_v48, %v862_v47 }
 0x196   :  { %v799_v51 = vmin.f32 %v704_v57, 0.0  ;;  %940 = vadd.xlane.f32.xlu2 %v898_v50  ;;  %v767_v52 = vmax.f32 %v704_v57, 0.0 }
 0x198   :  { %v831_v53 = vmul.f32 %v799_v51, %v1734_v44 }
 0x19a   :  { %v863_v54 = vadd.f32 %v831_v53, %v767_v52 }
 0x19b   :  { %v706_v55 = vpop.f32.mrf.mxu2 }
 0x19c   :  { %v707_v29 = vadd.f32 %v1831_v33, %v706_v55  ;;  %v899_v56 = vmul.f32 %v1843_v48, %v863_v54  ;;  %v1954_v54 = vadd.s32 4294967280, %v1944_v35 }
 0x19e   :  { %v800_v58 = vmin.f32 %v707_v29, 0.0  ;;  %942 = vadd.xlane.f32.xlu1 %v899_v56  ;;  %v768_v42 = vmax.f32 %v707_v29, 0.0 }
 0x1a0   :  { %v832_v59 = vmul.f32 %v800_v58, %v1734_v44 }
 0x1a2   :  { %v864_v60 = vadd.f32 %v832_v59, %v768_v42 }
 0x1a3   :  { %v708_v61 = vpop.f32.mrf.mxu2 }
 0x1a4   :  { %v709_v39 = vadd.f32 %v1831_v33, %v708_v61  ;;  %v900_v63 = vmul.f32 %v1843_v48, %v864_v60 }
 0x1a6   :  { %v801_v0 = vmin.f32 %v709_v39, 0.0  ;;  %944 = vadd.xlane.f32.xlu0 %v900_v63  ;;  %v769_v1 = vmax.f32 %v709_v39, 0.0 }
 0x1a8   :  { %v833_v2 = vmul.f32 %v801_v0, %v1734_v44 }
 0x1aa   :  { %v865_v4 = vadd.f32 %v833_v2, %v769_v1 }
 0x1ab   :  { %v711_v6 = vpop.f32.mrf.mxu2 }
 0x1ac   :  { %v712_v7 = vadd.f32 %v1831_v33, %v711_v6  ;;  %v901_v8 = vmul.f32 %v1843_v48, %v865_v4 }
 0x1ae   :  { %v802_v9 = vmin.f32 %v712_v7, 0.0  ;;  %946 = vadd.xlane.f32.xlu2 %v901_v8  ;;  %v770_v10 = vmax.f32 %v712_v7, 0.0 }
 0x1b0   :  { %v834_v11 = vmul.f32 %v802_v9, %v1734_v44 }
 0x1b2   :  { %v866_v12 = vadd.f32 %v834_v11, %v770_v10 }
 0x1b3   :  { %v1929_v13 = vpop.f32.mrf.mxu2 }
 0x1b4   :  { %v902_v15 = vmul.f32 %v1843_v48, %v866_v12 }
 0x1b6   :  { %948 = vadd.xlane.f32.xlu1 %v902_v15 }
 0x1b9   :  { %v921_v16 = vpop.xlane.xlu0 %920 }
 0x1ba   :  { %v985_v21 = vadd.f32 %v1933_v62, %v921_v16 }
 0x1bb   :  { %v716_v18 = vpop.f32.mrf.mxu2 }
 0x1bc   :  { %v717_v3 = vadd.f32 %v1831_v33, %v716_v18  ;;  %v1049_v27 = vmin.f32 %v985_v21, 0.0  ;;  %v1017_v47 = vmax.f32 %v985_v21, 0.0 }
 0x1be   :  { %v804_v17 = vmin.f32 %v717_v3, 0.0  ;;  %v772_v19 = vmax.f32 %v717_v3, 0.0  ;;  %v1082_v36 = vmul.f32 %v1940_v28, %v1049_v27 }
 0x1c0   :  { %v836_v20 = vmul.f32 %v804_v17, %v1734_v44  ;;  %v1114_v52 = vadd.f32 %v1082_v36, %v1017_v47 }
 0x1c1   :  { %v923_v5 = vpop.xlane.xlu0 %922 }
 0x1c2   :  { %v986_v30 = vadd.f32 %v1933_v62, %v923_v5  ;;  %v868_v32 = vadd.f32 %v836_v20, %v772_v19  ;;  %v1180_v60 = vperm.slane %v1114_v52, %v1944_v35 }
 0x1c3   :  { %v718_v22 = vpop.f32.mrf.mxu2 }
 0x1c4   :  { %v1050_v23 = vmin.f32 %v986_v30, 0.0  ;;  %v719_v24 = vadd.f32 %v1831_v33, %v718_v22  ;;  %v904_v25 = vmul.f32 %v1843_v48, %v868_v32  ;;  %v1018_v37 = vmax.f32 %v986_v30, 0.0 }
 0x1c6   :  { %v805_v31 = vmin.f32 %v719_v24, 0.0  ;;  %952 = vadd.xlane.f32.xlu1 %v904_v25  ;;  %v1083_v43 = vmul.f32 %v1940_v28, %v1050_v23  ;;  %v773_v14 = vmax.f32 %v719_v24, 0.0 }
 0x1c8   :  { %v837_v34 = vmul.f32 %v805_v31, %v1734_v44  ;;  %v1115_v49 = vadd.f32 %v1083_v43, %v1018_v37 }
 0x1c9   :  { %v925_v38 = vpop.xlane.xlu1 %924 }
 0x1ca   :  { %v869_v40 = vadd.f32 %v837_v34, %v773_v14  ;;  %v987_v45 = vadd.f32 %v1933_v62, %v925_v38  ;;  %v1182_v56 = vperm.slane %v1115_v49, %v1948_v41 }
 0x1cb   :  { %v721_v46 = vpop.f32.mrf.mxu2 }
 0x1cc   :  { %v722_v57 = vadd.f32 %v1831_v33, %v721_v46  ;;  %v905_v50 = vmul.f32 %v1843_v48, %v869_v40  ;;  %v1051_v51 = vmin.f32 %v987_v45, 0.0  ;;  %v1019_v55 = vmax.f32 %v987_v45, 0.0 }
 0x1cd   :  { %v1184_v0 = vsel %vm1183_vm2, %v1182_v56, %v1180_v60 }
 0x1ce   :  { %v806_v53 = vmin.f32 %v722_v57, 0.0  ;;  %954 = vadd.xlane.f32.xlu2 %v905_v50  ;;  %v1084_v29 = vmul.f32 %v1940_v28, %v1051_v51  ;;  %v774_v58 = vmax.f32 %v722_v57, 0.0 }
 0x1d0   :  { %v838_v42 = vmul.f32 %v806_v53, %v1734_v44  ;;  %v1116_v59 = vadd.f32 %v1084_v29, %v1019_v55 }
 0x1d2   :  { %v870_v61 = vadd.f32 %v838_v42, %v774_v58  ;;  %v1186_v39 = vperm.slane %v1116_v59, %v1954_v54 }
 0x1d3   :  { %v723_v63 = vpop.f32.mrf.mxu2 }
 0x1d4   :  { %v724_v1 = vadd.f32 %v1831_v33, %v723_v63  ;;  %v906_v2 = vmul.f32 %v1843_v48, %v870_v61  ;;  %v1965_v4 = vsel %vm1187_vm3, %v1186_v39, %v1184_v0 }
 0x1d6   :  { %v807_v6 = vmin.f32 %v724_v1, 0.0  ;;  %956 = vadd.xlane.f32.xlu0 %v906_v2  ;;  %v775_v7 = vmax.f32 %v724_v1, 0.0 }
 0x1d8   :  { %v839_v8 = vmul.f32 %v807_v6, %v1734_v44 }
 0x1da   :  { %v871_v9 = vadd.f32 %v839_v8, %v775_v7 }
 0x1db   :  { %v726_v10 = vpop.f32.mrf.mxu2 }
 0x1dc   :  { %v907_v11 = vmul.f32 %v1843_v48, %v871_v9  ;;  %v727_v12 = vadd.f32 %v1831_v33, %v726_v10 }
 0x1de   :  { %958 = vadd.xlane.f32.xlu1 %v907_v11  ;;  %v808_v15 = vmin.f32 %v727_v12, 0.0  ;;  %v776_v16 = vmax.f32 %v727_v12, 0.0 }
 0x1e0   :  { %v840_v18 = vmul.f32 %v808_v15, %v1734_v44 }
 0x1e2   :  { %v872_v3 = vadd.f32 %v840_v18, %v776_v16 }
 0x1e3   :  { %v728_v19 = vpop.f32.mrf.mxu2 }
 0x1e4   :  { %v736_v17 = vpop.f32.mrf.mxu3  ;;  %v729_v5 = vadd.f32 %v1831_v33, %v728_v19  ;;  %v908_v21 = vmul.f32 %v1843_v48, %v872_v3 }
 0x1e5   :  { %v737_v20 = vadd.f32 %v1831_v33, %v736_v17 }
 0x1e6   :  { %960 = vadd.xlane.f32.xlu2 %v908_v21  ;;  %v809_v23 = vmin.f32 %v729_v5, 0.0  ;;  %v777_v34 = vmax.f32 %v729_v5, 0.0  ;;  %v714_v5 = vadd.f32 %v1831_v33, %v1929_v13 }
 0x1e7   :  { %v812_v30 = vmin.f32 %v737_v20, 0.0  ;;  %v780_v32 = vmax.f32 %v737_v20, 0.0 }
 0x1e8   :  { %v841_v27 = vmul.f32 %v809_v23, %v1734_v44 }
 0x1e9   :  { %v844_v22 = vmul.f32 %v812_v30, %v1734_v44 }
 0x1ea   :  { %v873_v45 = vadd.f32 %v841_v27, %v777_v34 }
 0x1eb   :  { %v876_v24 = vadd.f32 %v844_v22, %v780_v32  ;;  %v731_v26 = vpop.f32.mrf.mxu2  ;;  %v803_v22 = vmin.f32 %v714_v5, 0.0 }
 0x1ec   :  { %v738_v25 = vpop.f32.mrf.mxu3  ;;  %v732_v43 = vadd.f32 %v1831_v33, %v731_v26  ;;  %v909_v53 = vmul.f32 %v1843_v48, %v873_v45 }
 0x1ed   :  { %v739_v31 = vadd.f32 %v1831_v33, %v738_v25  ;;  %v912_v14 = vmul.f32 %v1843_v48, %v876_v24  ;;  %v835_v27 = vmul.f32 %v803_v22, %v1734_v44 }
 0x1ee   :  { %v810_v37 = vmin.f32 %v732_v43, 0.0  ;;  %v778_v55 = vmax.f32 %v732_v43, 0.0 }
 0x1ef   :  { %v813_v36 = vmin.f32 %v739_v31, 0.0  ;;  %968 = vadd.xlane.f32.xlu0 %v912_v14  ;;  %v781_v38 = vmax.f32 %v739_v31, 0.0  ;;  %v771_v14 = vmax.f32 %v714_v5, 0.0  ;;  %v2035_v5 = vadd.s32 4294967272, %v1944_v35 }
 0x1f0   :  { %v842_v47 = vmul.f32 %v810_v37, %v1734_v44 }
 0x1f1   :  { %v845_v40 = vmul.f32 %v813_v36, %v1734_v44  ;;  %v867_v37 = vadd.f32 %v835_v27, %v771_v14 }
 0x1f2   :  { %v874_v58 = vadd.f32 %v842_v47, %v778_v55  ;;  %v929_v55 = vpop.xlane.xlu2 %928 }
 0x1f3   :  { %v877_v46 = vadd.f32 %v845_v40, %v781_v38  ;;  %v733_v57 = vpop.f32.mrf.mxu2  ;;  %v903_v47 = vmul.f32 %v1843_v48, %v867_v37  ;;  %v2051_v37 = vadd.s32 4294967248, %v1944_v35 }
 0x1f4   :  { %v741_v49 = vpop.f32.mrf.mxu3  ;;  %v734_v51 = vadd.f32 %v1831_v33, %v733_v57  ;;  %v910_v2 = vmul.f32 %v1843_v48, %v874_v58 }
 0x1f5   :  { %v742_v50 = vadd.f32 %v1831_v33, %v741_v49  ;;  %v913_v52 = vmul.f32 %v1843_v48, %v877_v46 }
 0x1f6   :  { %v811_v56 = vmin.f32 %v734_v51, 0.0  ;;  %v779_v60 = vmax.f32 %v734_v51, 0.0 }
 0x1f7   :  { %v814_v29 = vmin.f32 %v742_v50, 0.0  ;;  %970 = vadd.xlane.f32.xlu1 %v913_v52  ;;  %962 = vadd.xlane.f32.xlu0 %v909_v53  ;;  %v782_v42 = vmax.f32 %v742_v50, 0.0  ;;  %v927_v53 = vpop.xlane.xlu1 %926 }
 0x1f8   :  { %v843_v61 = vmul.f32 %v811_v56, %v1734_v44  ;;  %v933_v56 = vpop.xlane.xlu0 %932 }
 0x1f9   :  { %v846_v59 = vmul.f32 %v814_v29, %v1734_v44 }
 0x1fa   :  { %v875_v63 = vadd.f32 %v843_v61, %v779_v60  ;;  %v931_v58 = vpop.xlane.xlu2 %930 }
 0x1fb   :  { %v878_v39 = vadd.f32 %v846_v59, %v782_v42 }
 0x1fc   :  { %v743_v0 = vpop.f32.mrf.mxu3  ;;  %v911_v7 = vmul.f32 %v1843_v48, %v875_v63 }
 0x1fd   :  { %v744_v1 = vadd.f32 %v1831_v33, %v743_v0  ;;  %v914_v6 = vmul.f32 %v1843_v48, %v878_v39  ;;  %v989_v0 = vadd.f32 %v1933_v62, %v929_v55 }
 0x1fe   :  { %966 = vadd.xlane.f32.xlu2 %v911_v7  ;;  %v991_v7 = vadd.f32 %v1933_v62, %v933_v56 }
 0x1ff   :  { %v815_v8 = vmin.f32 %v744_v1, 0.0  ;;  %964 = vadd.xlane.f32.xlu1 %v910_v2  ;;  %972 = vadd.xlane.f32.xlu0 %v914_v6  ;;  %v783_v9 = vmax.f32 %v744_v1, 0.0  ;;  %v935_v29 = vpop.xlane.xlu1 %934  ;;  %v990_v6 = vadd.f32 %v1933_v62, %v931_v58  ;;  %v1021_v22 = vmax.f32 %v989_v0, 0.0 }
 0x201   :  { %v847_v10 = vmul.f32 %v815_v8, %v1734_v44  ;;  %v939_v42 = vpop.xlane.xlu0 %938  ;;  %v1053_v8 = vmin.f32 %v989_v0, 0.0  ;;  %v1022_v14 = vmax.f32 %v990_v6, 0.0 }
 0x202   :  { %v937_v59 = vpop.xlane.xlu2 %936 }
 0x203   :  { %v879_v11 = vadd.f32 %v847_v10, %v783_v9  ;;  %v992_v9 = vadd.f32 %v1933_v62, %v935_v29  ;;  %v2062_v29 = vadd.s32 4294967232, %v1944_v35 }
 0x204   :  { %v746_v12 = vpop.f32.mrf.mxu3 }
 0x205   :  { %v747_v15 = vadd.f32 %v1831_v33, %v746_v12  ;;  %v915_v16 = vmul.f32 %v1843_v48, %v879_v11  ;;  %v1054_v12 = vmin.f32 %v990_v6, 0.0 }
 0x207   :  { %v816_v18 = vmin.f32 %v747_v15, 0.0  ;;  %974 = vadd.xlane.f32.xlu2 %v915_v16  ;;  %v784_v3 = vmax.f32 %v747_v15, 0.0  ;;  %v993_v15 = vadd.f32 %v1933_v62, %v937_v59 }
 0x209   :  { %v848_v17 = vmul.f32 %v816_v18, %v1734_v44  ;;  %v1055_v18 = vmin.f32 %v991_v7, 0.0 }
 0x20a   :  { %v941_v39 = vpop.xlane.xlu2 %940 }
 0x20b   :  { %v880_v19 = vadd.f32 %v848_v17, %v784_v3  ;;  %v994_v3 = vadd.f32 %v1933_v62, %v939_v42  ;;  %v995_v27 = vadd.f32 %v1933_v62, %v941_v39 }
 0x20c   :  { %v748_v20 = vpop.f32.mrf.mxu3 }
 0x20d   :  { %v749_v21 = vadd.f32 %v1831_v33, %v748_v20  ;;  %v916_v30 = vmul.f32 %v1843_v48, %v880_v19  ;;  %v1086_v19 = vmul.f32 %v1940_v28, %v1053_v8  ;;  %v1056_v20 = vmin.f32 %v992_v9, 0.0 }
 0x20e   :  { %v1026_v56 = vmax.f32 %v994_v3, 0.0 }
 0x20f   :  { %v817_v32 = vmin.f32 %v749_v21, 0.0  ;;  %976 = vadd.xlane.f32.xlu1 %v916_v30  ;;  %v785_v23 = vmax.f32 %v749_v21, 0.0 }
 0x211   :  { %v849_v24 = vmul.f32 %v817_v32, %v1734_v44  ;;  %v2038_v32 = vadd.s32 4294967264, %v1944_v35 }
 0x213   :  { %v881_v25 = vadd.f32 %v849_v24, %v785_v23  ;;  %v1087_v23 = vmul.f32 %v1940_v28, %v1054_v12  ;;  %v1057_v24 = vmin.f32 %v993_v15, 0.0  ;;  %v2078_v12 = vadd.s32 4294967216, %v1944_v35 }
 0x214   :  { %v751_v26 = vpop.f32.mrf.mxu3 }
 0x215   :  { %v752_v31 = vadd.f32 %v1831_v33, %v751_v26  ;;  %v917_v43 = vmul.f32 %v1843_v48, %v881_v25  ;;  %v1088_v25 = vmul.f32 %v1940_v28, %v1055_v18  ;;  %v1058_v26 = vmin.f32 %v994_v3, 0.0 }
 0x217   :  { %v818_v13 = vmin.f32 %v752_v31, 0.0  ;;  %978 = vadd.xlane.f32.xlu0 %v917_v43  ;;  %v786_v34 = vmax.f32 %v752_v31, 0.0  ;;  %v1118_v31 = vadd.f32 %v1086_v19, %v1021_v22  ;;  %v2044_v43 = vadd.s32 4294967256, %v1944_v35 }
 0x219   :  { %v850_v36 = vmul.f32 %v818_v13, %v1734_v44  ;;  %v2013_v61 = vpop.xlane.xlu0 %944  ;;  %v1089_v13 = vmul.f32 %v1940_v28, %v1056_v20 }
 0x21b   :  { %v882_v38 = vadd.f32 %v850_v36, %v786_v34 }
 0x21c   :  { %v753_v40 = vpop.f32.mrf.mxu3 }
 0x21d   :  { %v754_v45 = vadd.f32 %v1831_v33, %v753_v40  ;;  %v918_v46 = vmul.f32 %v1843_v48, %v882_v38  ;;  %v2009_v33 = vpop.xlane.xlu1 %942  ;;  %v1023_v38 = vmax.f32 %v991_v7, 0.0  ;;  %v1119_v40 = vadd.f32 %v1087_v23, %v1022_v14 }
 0x21f   :  { %v819_v49 = vmin.f32 %v754_v45, 0.0  ;;  %980 = vadd.xlane.f32.xlu2 %v918_v46  ;;  %950 = vadd.xlane.f32.xlu0 %v903_v47  ;;  %v787_v57 = vmax.f32 %v754_v45, 0.0  ;;  %v1024_v45 = vmax.f32 %v992_v9, 0.0  ;;  %v1090_v46 = vmul.f32 %v1940_v28, %v1057_v24 }
 0x220   :  { %v1120_v47 = vadd.f32 %v1088_v25, %v1023_v38  ;;  %v1198_v59 = vperm.slane %v1119_v40, %v2044_v43  ;;  %v2102_v38 = vadd.s32 4294967192, %v1944_v35 }
 0x221   :  { %v851_v50 = vmul.f32 %v819_v49, %v1734_v44  ;;  %v988_v44 = vadd.f32 %v1933_v62, %v927_v53  ;;  %v2021_v2 = vpop.xlane.xlu2 %946  ;;  %v2055_v49 = vadd.s32 4294967240, %v1944_v35  ;;  %v1025_v53 = vmax.f32 %v993_v15, 0.0 }
 0x222   :  { %v1027_v15 = vmax.f32 %v995_v27, 0.0 }
 0x223   :  { %v883_v51 = vadd.f32 %v851_v50, %v787_v57  ;;  %v1052_v1 = vmin.f32 %v988_v44, 0.0  ;;  %v1020_v16 = vmax.f32 %v988_v44, 0.0  ;;  %v1091_v57 = vmul.f32 %v1940_v28, %v1058_v26 }
 0x224   :  { %v1059_v50 = vmin.f32 %v995_v27, 0.0  ;;  %v1122_v39 = vadd.f32 %v1090_v46, %v1025_v53  ;;  %v2066_v44 = vadd.s32 4294967224, %v1944_v35  ;;  %v2097_v27 = vadd.s32 4294967200, %v1944_v35 }
 0x225   :  { %v919_v52 = vmul.f32 %v1843_v48, %v883_v51  ;;  %v1085_v11 = vmul.f32 %v1940_v28, %v1052_v1  ;;  %v1194_v51 = vperm.slane %v1118_v31, %v2038_v32  ;;  %v1202_v1 = vperm.slane %v1120_v47, %v2051_v37 }
 0x226   :  { %v1123_v6 = vadd.f32 %v1091_v57, %v1026_v56  ;;  %v1210_v19 = vperm.slane %v1122_v39, %v2062_v29  ;;  %v2111_v57 = vadd.s32 4294967184, %v1944_v35 }
 0x227   :  { %982 = vadd.xlane.f32.xlu1 %v919_v52  ;;  %v1117_v21 = vadd.f32 %v1085_v11, %v1020_v16  ;;  %v1121_v52 = vadd.f32 %v1089_v13, %v1024_v45  ;;  %v996_v16 = vadd.f32 %v1933_v62, %v2009_v33 }
 0x229   :  { %v2011_v60 = vpop.xlane.xlu1 %948  ;;  %v1190_v36 = vperm.slane %v1117_v21, %v2035_v5  ;;  %v1206_v8 = vperm.slane %v1121_v52, %v2055_v49  ;;  %v1060_v26 = vmin.f32 %v996_v16, 0.0 }
 0x22b   :  { %v1192_v55 = vsel %vm1191_vm4, %v1190_v36, %v1965_v4  ;;  %v1092_v4 = vmul.f32 %v1940_v28, %v1059_v50 }
 0x22c   :  { %v1196_v7 = vsel %vm1195_vm5, %v1194_v51, %v1192_v55 }
 0x22d   :  { %v1200_v3 = vsel %vm1199_vm6, %v1198_v59, %v1196_v7  ;;  %v2089_v22 = vadd.f32 %v1092_v4, %v1027_v15 }
 0x22f   :  { %v1218_v47 = vperm.slane %v2089_v22, %v2078_v12 }
 0x239   :  { %v2015_v63 = vpop.xlane.xlu1 %952 }
 0x23a   :  { %v1001_v9 = vadd.f32 %v1933_v62, %v2015_v63 }
 0x23c   :  { %v1065_v24 = vmin.f32 %v1001_v9, 0.0 }
 0x23e   :  { %v1098_v52 = vmul.f32 %v1940_v28, %v1065_v24 }
 0x241   :  { %v955_v30 = vpop.xlane.xlu2 %954 }
 0x242   :  { %v1002_v0 = vadd.f32 %v1933_v62, %v955_v30  ;;  %v1214_v30 = vperm.slane %v1123_v6, %v2066_v44 }
 0x244   :  { %v1066_v20 = vmin.f32 %v1002_v0, 0.0  ;;  %v1034_v53 = vmax.f32 %v1002_v0, 0.0  ;;  %v2125_v0 = vadd.f32 %v1933_v62, %v2021_v2 }
 0x246   :  { %v1099_v40 = vmul.f32 %v1940_v28, %v1066_v20 }
 0x248   :  { %v1131_v6 = vadd.f32 %v1099_v40, %v1034_v53 }
 0x249   :  { %v2018_v48 = vpop.xlane.xlu0 %956 }
 0x24a   :  { %v1003_v11 = vadd.f32 %v1933_v62, %v2018_v48  ;;  %v1204_v48 = vsel %vm1203_vm7, %v1202_v1, %v1200_v3  ;;  %v1033_v1 = vmax.f32 %v1001_v9, 0.0  ;;  %v1242_v2 = vperm.slane %v1131_v6, %v1948_v41 }
 0x24b   :  { %v1208_v33 = vsel %vm1207_vm8, %v1206_v8, %v1204_v48  ;;  %v1028_v8 = vmax.f32 %v996_v16, 0.0  ;;  %v2144_v41 = vadd.f32 %v1933_v62, %v2011_v60 }
 0x24c   :  { %v1067_v25 = vmin.f32 %v1003_v11, 0.0  ;;  %v1212_v36 = vsel %vm1211_vm9, %v1210_v19, %v1208_v33  ;;  %v1035_v4 = vmax.f32 %v1003_v11, 0.0  ;;  %v1130_v19 = vadd.f32 %v1098_v52, %v1033_v1 }
 0x24d   :  { %v2106_v46 = vsel %vm1215_vm10, %v1214_v30, %v1212_v36 }
 0x24e   :  { %v1100_v55 = vmul.f32 %v1940_v28, %v1067_v25 }
 0x250   :  { %v1132_v20 = vadd.f32 %v1100_v55, %v1035_v4 }
 0x251   :  { %v2026_v10 = vpop.xlane.xlu1 %958 }
 0x252   :  { %v1004_v18 = vadd.f32 %v1933_v62, %v2026_v10  ;;  %v2094_v10 = vadd.s32 4294967208, %v1944_v35  ;;  %v1244_v36 = vperm.slane %v1132_v20, %v1954_v54 }
 0x254   :  { %v1068_v31 = vmin.f32 %v1004_v18, 0.0  ;;  %v1036_v15 = vmax.f32 %v1004_v18, 0.0 }
 0x256   :  { %v1101_v59 = vmul.f32 %v1940_v28, %v1068_v31 }
 0x258   :  { %v1133_v48 = vadd.f32 %v1101_v59, %v1036_v15 }
 0x259   :  { %v961_v58 = vpop.xlane.xlu2 %960 }
 0x25a   :  { %v1005_v63 = vadd.f32 %v1933_v62, %v961_v58  ;;  %v1093_v58 = vmul.f32 %v1940_v28, %v1060_v26 }
 0x25c   :  { %v1069_v45 = vmin.f32 %v1005_v63, 0.0  ;;  %v2131_v33 = vadd.f32 %v1093_v58, %v1028_v8 }
 0x25e   :  { %v1102_v7 = vmul.f32 %v1940_v28, %v1069_v45 }
 0x262   :  { %v2031_v17 = vpop.xlane.xlu0 %968 }
 0x263   :  { %v1009_v9 = vadd.f32 %v1933_v62, %v2031_v17  ;;  %v1062_v17 = vmin.f32 %v2125_v0, 0.0 }
 0x265   :  { %v1095_v4 = vmul.f32 %v1940_v28, %v1062_v17  ;;  %v1041_v8 = vmax.f32 %v1009_v9, 0.0 }
 0x26a   :  { %v2047_v34 = vpop.xlane.xlu1 %970  ;;  %v963_v42 = vpop.xlane.xlu0 %962 }
 0x26b   :  { %v1006_v23 = vadd.f32 %v1933_v62, %v963_v42  ;;  %v2119_v42 = vadd.f32 %v1933_v62, %v2013_v61  ;;  %v1037_v61 = vmax.f32 %v1005_v63, 0.0  ;;  %v1010_v63 = vadd.f32 %v1933_v62, %v2047_v34 }
 0x26c   :  { %v1073_v34 = vmin.f32 %v1009_v9, 0.0  ;;  %v1030_v9 = vmax.f32 %v2125_v0, 0.0 }
 0x26d   :  { %v1070_v50 = vmin.f32 %v1006_v23, 0.0  ;;  %v1038_v30 = vmax.f32 %v1006_v23, 0.0  ;;  %v1029_v16 = vmax.f32 %v2119_v42, 0.0  ;;  %v1134_v18 = vadd.f32 %v1102_v7, %v1037_v61 }
 0x26e   :  { %v1061_v24 = vmin.f32 %v2119_v42, 0.0  ;;  %v1241_v23 = vperm.slane %v1130_v19, %v1944_v35  ;;  %v1074_v42 = vmin.f32 %v1010_v63, 0.0 }
 0x26f   :  { %v1103_v3 = vmul.f32 %v1940_v28, %v1070_v50  ;;  %v1246_v50 = vperm.slane %v1133_v48, %v2035_v5  ;;  %v1248_v53 = vperm.slane %v1134_v18, %v2038_v32 }
 0x270   :  { %v1094_v60 = vmul.f32 %v1940_v28, %v1061_v24 }
 0x271   :  { %v967_v13 = vpop.xlane.xlu2 %966  ;;  %v1135_v25 = vadd.f32 %v1103_v3, %v1038_v30  ;;  %v1107_v3 = vmul.f32 %v1940_v28, %v1074_v42 }
 0x272   :  { %v965_v21 = vpop.xlane.xlu1 %964  ;;  %v973_v51 = vpop.xlane.xlu0 %972  ;;  %v1008_v56 = vadd.f32 %v1933_v62, %v967_v13  ;;  %v1126_v18 = vadd.f32 %v1094_v60, %v1029_v16 }
 0x273   :  { %v1007_v14 = vadd.f32 %v1933_v62, %v965_v21  ;;  %v1250_v54 = vperm.slane %v1135_v25, %v2044_v43  ;;  %v1011_v59 = vadd.f32 %v1933_v62, %v973_v51  ;;  %v1063_v43 = vmin.f32 %v2144_v41, 0.0 }
 0x274   :  { %v1072_v21 = vmin.f32 %v1008_v56, 0.0  ;;  %v1040_v55 = vmax.f32 %v1008_v56, 0.0  ;;  %v1106_v56 = vmul.f32 %v1940_v28, %v1073_v34 }
 0x275   :  { %v1071_v39 = vmin.f32 %v1007_v14, 0.0  ;;  %v1039_v26 = vmax.f32 %v1007_v14, 0.0  ;;  %v1243_v14 = vsel %vm1183_vm2, %v1242_v2, %v1241_v23  ;;  %v1075_v20 = vmin.f32 %v1011_v59, 0.0 }
 0x276   :  { %v1105_v40 = vmul.f32 %v1940_v28, %v1072_v21  ;;  %v1245_v5 = vsel %vm1187_vm3, %v1244_v36, %v1243_v14  ;;  %v1138_v24 = vadd.f32 %v1106_v56, %v1041_v8  ;;  %v1127_v23 = vadd.f32 %v1095_v4, %v1030_v9 }
 0x277   :  { %v1104_v11 = vmul.f32 %v1940_v28, %v1071_v39  ;;  %v1247_v32 = vsel %vm1191_vm4, %v1246_v50, %v1245_v5  ;;  %v1108_v36 = vmul.f32 %v1940_v28, %v1075_v20  ;;  %v1043_v34 = vmax.f32 %v1011_v59, 0.0 }
 0x278   :  { %v1137_v1 = vadd.f32 %v1105_v40, %v1040_v55  ;;  %v1249_v51 = vsel %vm1195_vm5, %v1248_v53, %v1247_v32  ;;  %v1031_v53 = vmax.f32 %v2144_v41, 0.0  ;;  %v1222_v56 = vperm.slane %v2131_v33, %v2094_v10 }
 0x279   :  { %v1136_v52 = vadd.f32 %v1104_v11, %v1039_v26  ;;  %v1251_v19 = vsel %vm1199_vm6, %v1250_v54, %v1249_v51  ;;  %v1042_v26 = vmax.f32 %v1010_v63, 0.0  ;;  %v1256_v63 = vperm.slane %v1138_v24, %v2062_v29 }
 0x27a   :  { %v975_v31 = vpop.xlane.xlu2 %974  ;;  %v1254_v30 = vperm.slane %v1137_v1, %v2055_v49  ;;  %v1096_v49 = vmul.f32 %v1940_v28, %v1063_v43  ;;  %v1140_v60 = vadd.f32 %v1108_v36, %v1043_v34 }
 0x27b   :  { %v1012_v58 = vadd.f32 %v1933_v62, %v975_v31  ;;  %v1252_v7 = vperm.slane %v1136_v52, %v2051_v37 }
 0x27c   :  { %v1128_v41 = vadd.f32 %v1096_v49, %v1031_v53  ;;  %v1260_v33 = vperm.slane %v1140_v60, %v2078_v12 }
 0x27d   :  { %v1076_v15 = vmin.f32 %v1012_v58, 0.0  ;;  %v1253_v25 = vsel %vm1203_vm7, %v1252_v7, %v1251_v19  ;;  %v1044_v0 = vmax.f32 %v1012_v58, 0.0 }
 0x27e   :  { %v1255_v16 = vsel %vm1207_vm8, %v1254_v30, %v1253_v25 }
 0x27f   :  { %v1109_v31 = vmul.f32 %v1940_v28, %v1076_v15  ;;  %v1257_v5 = vsel %vm1211_vm9, %v1256_v63, %v1255_v16 }
 0x281   :  { %v1141_v55 = vadd.f32 %v1109_v31, %v1044_v0 }
 0x282   :  { %v977_v45 = vpop.xlane.xlu1 %976 }
 0x283   :  { %v1013_v39 = vadd.f32 %v1933_v62, %v977_v45  ;;  %v1139_v45 = vadd.f32 %v1107_v3, %v1042_v26  ;;  %v1262_v51 = vperm.slane %v1141_v55, %v2094_v10 }
 0x285   :  { %v1077_v61 = vmin.f32 %v1013_v39, 0.0  ;;  %v1045_v52 = vmax.f32 %v1013_v39, 0.0  ;;  %v1258_v32 = vperm.slane %v1139_v45, %v2066_v44  ;;  %v1220_v44 = vsel %vm1219_vm11, %v1218_v47, %v2106_v46 }
 0x286   :  { %v1224_v46 = vsel %vm1223_vm12, %v1222_v56, %v1220_v44 }
 0x287   :  { %v1110_v40 = vmul.f32 %v1940_v28, %v1077_v61  ;;  %v1259_v43 = vsel %vm1215_vm10, %v1258_v32, %v1257_v5  ;;  %v1234_v61 = vperm.slane %v1128_v41, %v2111_v57 }
 0x289   :  { %v1142_v58 = vadd.f32 %v1110_v40, %v1045_v52 }
 0x28a   :  { %v979_v13 = vpop.xlane.xlu0 %978 }
 0x28b   :  { %v1014_v6 = vadd.f32 %v1933_v62, %v979_v13  ;;  %v1264_v3 = vperm.slane %v1142_v58, %v2097_v27 }
 0x28d   :  { %v1078_v11 = vmin.f32 %v1014_v6, 0.0  ;;  %v1046_v42 = vmax.f32 %v1014_v6, 0.0  ;;  %v1237_v6 = vadd.s32 4294967176, %v1944_v35  ;;  %v1230_v35 = vperm.slane %v1127_v23, %v2102_v38 }
 0x28f   :  { %v1111_v50 = vmul.f32 %v1940_v28, %v1078_v11 }
 0x291   :  { %v1143_v29 = vadd.f32 %v1111_v50, %v1046_v42 }
 0x292   :  { %v981_v21 = vpop.xlane.xlu2 %980  ;;  %v951_v48 = vpop.xlane.xlu0 %950 }
 0x293   :  { %v1015_v37 = vadd.f32 %v1933_v62, %v981_v21  ;;  %v1000_v2 = vadd.f32 %v1933_v62, %v951_v48  ;;  %v1266_v19 = vperm.slane %v1143_v29, %v2102_v38  ;;  %v1261_v21 = vsel %vm1219_vm11, %v1260_v33, %v1259_v43 }
 0x294   :  { %v1263_v12 = vsel %vm1223_vm12, %v1262_v51, %v1261_v21 }
 0x295   :  { %v1079_v13 = vmin.f32 %v1015_v37, 0.0  ;;  %v1064_v17 = vmin.f32 %v1000_v2, 0.0  ;;  %v1047_v1 = vmax.f32 %v1015_v37, 0.0  ;;  %v1032_v59 = vmax.f32 %v1000_v2, 0.0 }
 0x296   :  { %v1265_v38 = vsel %vm1227_vm13, %v1264_v3, %v1263_v12 }
 0x297   :  { %v1112_v14 = vmul.f32 %v1940_v28, %v1079_v13  ;;  %v1097_v54 = vmul.f32 %v1940_v28, %v1064_v17  ;;  %v1267_v30 = vsel %vm1231_vm14, %v1266_v19, %v1265_v38 }
 0x299   :  { %v1144_v7 = vadd.f32 %v1112_v14, %v1047_v1  ;;  %v1129_v8 = vadd.f32 %v1097_v54, %v1032_v59 }
 0x29a   :  { %v983_v4 = vpop.xlane.xlu1 %982 }
 0x29b   :  { %v1016_v39 = vadd.f32 %v1933_v62, %v983_v4  ;;  %v1226_v62 = vperm.slane %v1126_v18, %v2097_v27  ;;  %v1268_v22 = vperm.slane %v1144_v7, %v2111_v57  ;;  %v1238_v47 = vperm.slane %v1129_v8, %v1237_v6 }
 0x29d   :  { %v1080_v15 = vmin.f32 %v1016_v39, 0.0  ;;  %v1048_v20 = vmax.f32 %v1016_v39, 0.0  ;;  %v1228_v48 = vsel %vm1227_vm13, %v1226_v62, %v1224_v46  ;;  %v1269_v37 = vsel %vm1235_vm15, %v1268_v22, %v1267_v30 }
 0x29e   :  { %v1232_v57 = vsel %vm1231_vm14, %v1230_v35, %v1228_v48 }
 0x29f   :  { %v1113_v10 = vmul.f32 %v1940_v28, %v1080_v15  ;;  %v1236_v11 = vsel %vm1235_vm15, %v1234_v61, %v1232_v57 }
 0x2a0   :  { %v1240_v2 = vsel %vm1239_vm0, %v1238_v47, %v1236_v11 }
 0x2a1   :  { %v1145_v27 = vadd.f32 %v1113_v10, %v1048_v20 }
 0x2a3   :  { %v1270_v28 = vperm.slane %v1145_v27, %v1237_v6 }
 0x2a5   :  { %v1271_v18 = vsel %vm1239_vm0, %v1270_v28, %v1269_v37 }
 0x2a6   :  { %v1273_v9 = vsel %vm1272_vm1, %v1271_v18, %v1240_v2 }
 0x2a7   :  { %1275 = vst [vmem:[#allocation5] sm:$0x3] %v1273_v9 }
 0x2a8   :  { %1286 = dma.vmem_to_hbm [thread:$0]  %s1282_s23, 32, %s1284_s26, [#allocation3]  }
 0x2a9   :  { %1462 = dma.done.wait [#allocation3], 32  }
 0x2aa   :  { %1463 = vsyncadd [#allocation3], 4294967264 }
 0x2ab   :  { %1291 = vsyncpa [#allocation3], 1 }
 0x2ac   :  { %1292 = vsyncpa [#allocation4], 1 }

</bundles_post_ra>
